<compile_context>
chip_gen: v5e
topology: v5e:2x2
jax: 0.10.0
libtpu: 0.0.40
codegen_flags: <defaults>
</compile_context>

<pallas_src>
import functools
import math

import jax
import jax.numpy as jnp
from jax import lax
from jax.experimental import pallas as pl
from jax.experimental.pallas import tpu as pltpu


def _layernorm(v, g, b, eps=1e-5):
    mu = jnp.mean(v, axis=-1, keepdims=True)
    var = jnp.mean((v - mu) ** 2, axis=-1, keepdims=True)
    return (v - mu) * lax.rsqrt(var + eps) * g + b


def _gelu(h, approx):
    if approx:
        # tanh approximation routes to the EUP slot (idle next to the MXU); for v5e.
        c = math.sqrt(2.0 / math.pi)
        return 0.5 * h * (1.0 + jnp.tanh(c * (h + 0.044715 * h * h * h)))
    return 0.5 * h * (1.0 + lax.erf(h * (1.0 / math.sqrt(2.0))))


def _block_kernel(x_ref, g1_ref, b1_ref, wqkv_ref, wp_ref, bp_ref,
                  g2_ref, b2_ref, w1_ref, bf1_ref, w2_ref, bf2_ref,
                  xo_ref, attn_ref, o_scratch,
                  *, num_heads, head_dim, compute_dtype, approx_recip, approx_gelu):
    x = x_ref[0]                                   # (N, C) f32
    N, C = x.shape

    # ---- norm1 + fused QKV projection (softmax scale pre-folded into Q columns) ----
    # qkv is only ever consumed by matmuls, so cast to compute_dtype immediately:
    # bounds its live bytes in the head loop and gives bf16 MXU inputs on the fast path.
    xn = _layernorm(x, g1_ref[...], b1_ref[...])
    qkv = jnp.dot(xn.astype(compute_dtype), wqkv_ref[...],
                  preferred_element_type=jnp.float32).astype(compute_dtype)  # (N, 3C)

    def head_context(h):
        lo = h * head_dim
        qh = qkv[:, lo:lo + head_dim]              # already scaled by head_dim**-0.5
        kh = qkv[:, C + lo:C + lo + head_dim]
        vh = qkv[:, 2 * C + lo:2 * C + lo + head_dim]
        # scores = qh @ kh^T without materializing the transpose; f32 accumulation.
        s = lax.dot_general(qh, kh, (((1,), (1,)), ((), ())),
                            preferred_element_type=jnp.float32)    # (N, N) f32
        s = s - jnp.max(s, axis=-1, keepdims=True)
        e = jnp.exp(s)
        inv = pl.reciprocal(jnp.sum(e, axis=-1, keepdims=True), approx=approx_recip)
        a = e * inv                                # row reciprocal + mul, no NxN divide
        attn_ref[0, h] = a.astype(attn_ref.dtype)  # attention-probability writeback
        ctx = jnp.dot(a.astype(compute_dtype), vh, preferred_element_type=jnp.float32)
        return ctx.astype(o_scratch.dtype)

    # ---- per-head attention; contexts concatenated into VMEM scratch ----
    # Static Python loop (head offsets must be static lane slices; H is small).
    # Process heads in pairs when head_dim is not a lane multiple so the scratch
    # stores are 2*head_dim wide (unmasked full-vreg stores for head_dim=64).
    pair = (num_heads % 2 == 0) and (head_dim % 128 != 0)
    step = 2 if pair else 1
    for h in range(0, num_heads, step):
        if pair:
            ctx = jnp.concatenate([head_context(h), head_context(h + 1)], axis=-1)
            o_scratch[:, h * head_dim:(h + 2) * head_dim] = ctx
        else:
            o_scratch[:, h * head_dim:(h + 1) * head_dim] = head_context(h)

    # ---- single full-width output projection over all heads (K = C) ----
    attn_out = jnp.dot(o_scratch[...], wp_ref[...],
                       preferred_element_type=jnp.float32) + bp_ref[...]
    x1 = x + attn_out                              # residual 1 (drop_path = identity)

    # ---- norm2 + MLP ----
    xn2 = _layernorm(x1, g2_ref[...], b2_ref[...])
    h1 = jnp.dot(xn2.astype(compute_dtype), w1_ref[...],
                 preferred_element_type=jnp.float32) + bf1_ref[...]
    h1 = _gelu(h1, approx_gelu)                    # f32 elementwise
    m = jnp.dot(h1.astype(compute_dtype), w2_ref[...],
                preferred_element_type=jnp.float32) + bf2_ref[...]
    xo_ref[0] = x1 + m                             # residual 2


def prepare_block_weights(params, num_heads, compute_dtype=jnp.bfloat16):
    """One-time weight prep (run at parameter load, NOT per layer call):
    fold the softmax scale into the Q columns of the fused QKV weight and cast the
    big matrices to the matmul compute dtype (accumulation stays f32 in-kernel)."""
    C = params["wqkv"].shape[0]
    head_dim = C // num_heads
    scale = head_dim ** (-0.5)
    # Assumes the fused QKV columns are laid out as [Q | K | V] in contiguous C-wide
    # blocks (the nn.Linear(dim, 3*dim) layout of the reference module).
    wqkv = params["wqkv"].astype(jnp.float32).at[:, :C].multiply(scale)
    f32 = jnp.float32
    return (
        params["g1"].astype(f32), params["b1"].astype(f32),
        wqkv.astype(compute_dtype), params["wp"].astype(compute_dtype),
        params["bp"].astype(f32),
        params["g2"].astype(f32), params["b2"].astype(f32),
        params["w1"].astype(compute_dtype), params["bf1"].astype(f32),
        params["w2"].astype(compute_dtype), params["bf2"].astype(f32),
    )


def _weight_spec(arr, single_buffer):
    nd = arr.ndim
    idx = lambda b, _nd=nd: (0,) * _nd
    if single_buffer:
        # Grid-invariant weights: single-buffer so the pipeline does not reserve 2x VMEM.
        return pl.BlockSpec(arr.shape, idx, pipeline_mode=pl.Buffered(1))
    return pl.BlockSpec(arr.shape, idx)


def _vmem_capacity_bytes():
    try:
        info = pltpu.get_tpu_info()
        cap = getattr(info, "vmem_capacity_bytes", None)
        if cap:
            return int(cap)
    except Exception:
        pass
    return 64 * 1024 * 1024   # conservative fallback (v7x per-TC VMEM)


def vit_block(x, weights, num_heads, *, compute_dtype=jnp.bfloat16, attn_dtype=None,
              approx_gelu=False):
    B, N, C = x.shape
    head_dim = C // num_heads
    (g1, b1, wqkv_c, wp_c, bp, g2, b2, w1_c, bf1, w2_c, bf2) = weights
    hidden = w1_c.shape[1]

    if attn_dtype is None:
        # attention-prob writeback is the largest HBM output; emit bf16 on the fast path.
        attn_dtype = jnp.float32 if compute_dtype == jnp.float32 else jnp.bfloat16
    approx_recip = compute_dtype != jnp.float32

    kernel = functools.partial(
        _block_kernel, num_heads=num_heads, head_dim=head_dim,
        compute_dtype=compute_dtype, approx_recip=approx_recip, approx_gelu=approx_gelu)

    x_spec = pl.BlockSpec((1, N, C), lambda b: (b, 0, 0))
    out_specs = (pl.BlockSpec((1, N, C), lambda b: (b, 0, 0)),
                 pl.BlockSpec((1, num_heads, N, N), lambda b: (b, 0, 0, 0)))
    out_shape = (jax.ShapeDtypeStruct((B, N, C), jnp.float32),
                 jax.ShapeDtypeStruct((B, num_heads, N, N), attn_dtype))

    # Resident-VMEM estimate: single-buffered weights + double-buffered I/O tiles +
    # scratch + the big in-kernel intermediates + Mosaic internal margin; clamped below
    # the physical per-core capacity (generation-aware, never 100 MiB on v7x).
    c_item = jnp.dtype(compute_dtype).itemsize
    a_item = jnp.dtype(attn_dtype).itemsize
    weight_bytes = (wqkv_c.size + wp_c.size + w1_c.size + w2_c.size) * c_item \
        + sum(p.size for p in (g1, b1, bp, g2, b2, bf1, bf2)) * 4 * 2
    io_bytes = 2 * (2 * N * C * 4 + num_heads * N * N * a_item)
    scratch_bytes = N * C * c_item
    inter_bytes = (N * 3 * C * (4 + c_item)      # qkv accum + cast
                   + 2 * N * hidden * 4          # MLP hidden (pre/post GELU)
                   + 4 * N * N * 4               # per-head score/exp temporaries (pair)
                   + 4 * N * C * 4)              # xn / x1 / xn2 / attn_out
    est = weight_bytes + io_bytes + scratch_bytes + inter_bytes + (4 << 20)
    cap = _vmem_capacity_bytes()
    vmem_limit = int(min(max(est, 16 * 1024 * 1024), cap - (2 << 20)))

    def call(single_buffer_weights):
        in_specs = [x_spec] + [_weight_spec(w, single_buffer_weights) for w in weights]
        return pl.pallas_call(
            kernel,
            grid=(B,),
            in_specs=in_specs,
            out_specs=out_specs,
            out_shape=out_shape,
            scratch_shapes=[pltpu.VMEM((N, C), compute_dtype)],  # concatenated head ctx
            compiler_params=pltpu.CompilerParams(
                dimension_semantics=("parallel",),
                vmem_limit_bytes=vmem_limit),
        )(x, *weights)

    try:
        return call(True)
    except Exception:
        # Fallback for JAX versions that reject pipeline_mode / Buffered(1).
        return call(False)


def ref_block(x, params, num_heads):
    """Pure-JAX reference matching the PyTorch module (eval mode, no dropout)."""
    B, N, C = x.shape
    hd = C // num_heads
    scale = hd ** (-0.5)

    def ln(v, g, b):
        mu = v.mean(-1, keepdims=True)
        var = ((v - mu) ** 2).mean(-1, keepdims=True)
        return (v - mu) / jnp.sqrt(var + 1e-5) * g + b

    xn = ln(x, params["g1"], params["b1"])
    qkv = xn @ params["wqkv"]
    qkv = qkv.reshape(B, N, 3, num_heads, hd).transpose(2, 0, 3, 1, 4)
    q, k, v = qkv[0], qkv[1], qkv[2]
    attn = (q @ jnp.swapaxes(k, -2, -1)) * scale
    attn = jax.nn.softmax(attn, axis=-1)
    o = (attn @ v).transpose(0, 2, 1, 3).reshape(B, N, C)
    o = o @ params["wp"] + params["bp"]
    x1 = x + o
    xn2 = ln(x1, params["g2"], params["b2"])
    h1 = xn2 @ params["w1"] + params["bf1"]
    h1 = 0.5 * h1 * (1.0 + lax.erf(h1 / jnp.sqrt(2.0)))
    m = h1 @ params["w2"] + params["bf2"]
    return x1 + m, attn


def make_params(key, dim, num_heads, mlp_ratio=4.0):
    hidden = int(dim * mlp_ratio)
    ks = jax.random.split(key, 8)
    f32 = jnp.float32
    # nn.Linear weights stored transposed to (in, out); qkv_bias=False (module default).
    return {
        "g1":   jnp.ones((1, dim), f32),
        "b1":   jnp.zeros((1, dim), f32),
        "wqkv": 0.02 * jax.random.normal(ks[0], (dim, 3 * dim), f32),
        "wp":   0.02 * jax.random.normal(ks[1], (dim, dim), f32),
        "bp":   0.01 * jax.random.normal(ks[2], (1, dim), f32),
        "g2":   jnp.ones((1, dim), f32),
        "b2":   jnp.zeros((1, dim), f32),
        "w1":   0.02 * jax.random.normal(ks[3], (dim, hidden), f32),
        "bf1":  0.01 * jax.random.normal(ks[4], (1, hidden), f32),
        "w2":   0.02 * jax.random.normal(ks[5], (hidden, dim), f32),
        "bf2":  0.01 * jax.random.normal(ks[6], (1, dim), f32),
    }


if __name__ == "__main__":
    B, N, C = 2, 8, 32
    num_heads = 4

    key = jax.random.PRNGKey(0)
    kx, kp = jax.random.split(key)
    x = jax.random.normal(kx, (B, N, C), jnp.float32)
    params = make_params(kp, C, num_heads)

    ref_x, ref_attn = ref_block(x, params, num_heads)

    # Exact-precision path (f32 matmul inputs, exact reciprocal, f32 attn output):
    # must match the PyTorch math tightly.
    w32 = prepare_block_weights(params, num_heads, compute_dtype=jnp.float32)
    out_x32, out_attn32 = jax.block_until_ready(
        vit_block(x, w32, num_heads, compute_dtype=jnp.float32))
    assert out_x32.shape == (B, N, C)
    assert out_attn32.shape == (B, num_heads, N, N)
    assert jnp.allclose(out_x32, ref_x, atol=1e-4, rtol=1e-4)
    assert jnp.allclose(out_attn32, ref_attn, atol=1e-5, rtol=1e-4)

    # Default fast path: bf16 matmul inputs, f32 accumulation / stats, bf16 attn writeback.
    wbf = prepare_block_weights(params, num_heads, compute_dtype=jnp.bfloat16)
    out_x, out_attn = jax.block_until_ready(vit_block(x, wbf, num_heads))
    assert out_x.dtype == jnp.float32 and out_attn.dtype == jnp.bfloat16
    assert jnp.allclose(out_x, ref_x, atol=3e-2, rtol=3e-2)
    assert jnp.allclose(out_attn.astype(jnp.float32), ref_attn, atol=2e-2, rtol=5e-2)

    print("KERNEL_OK")
</pallas_src>

<mosaic_0001>
module attributes {stable_mosaic.version = 11 : i64} {
  func.func @_block_kernel(%arg0: i32, %arg1: memref<1x8x32xf32, #tpu.memory_space<vmem>>, %arg2: memref<1x32xf32, #tpu.memory_space<vmem>>, %arg3: memref<1x32xf32, #tpu.memory_space<vmem>>, %arg4: memref<32x96xf32, #tpu.memory_space<vmem>>, %arg5: memref<32x32xf32, #tpu.memory_space<vmem>>, %arg6: memref<1x32xf32, #tpu.memory_space<vmem>>, %arg7: memref<1x32xf32, #tpu.memory_space<vmem>>, %arg8: memref<1x32xf32, #tpu.memory_space<vmem>>, %arg9: memref<32x128xf32, #tpu.memory_space<vmem>>, %arg10: memref<1x128xf32, #tpu.memory_space<vmem>>, %arg11: memref<128x32xf32, #tpu.memory_space<vmem>>, %arg12: memref<1x32xf32, #tpu.memory_space<vmem>>, %arg13: memref<1x8x32xf32, #tpu.memory_space<vmem>>, %arg14: memref<1x4x8x8xf32, #tpu.memory_space<vmem>>, %arg15: memref<8x32xf32, #tpu.memory_space<vmem>>) attributes {dimension_semantics = [#tpu.dimension_semantics<parallel>], iteration_bounds = array<i64: 2>, scalar_prefetch = 0 : i64, scratch_operands = 1 : i64, tpu.core_type = #tpu.core_type<tc>, window_params = [{transform_indices = @transform_0, window_bounds = array<i64: 1, 8, 32>}, {pipeline_mode = #tpu.pipeline_mode<synchronous>, transform_indices = @transform_1, window_bounds = array<i64: 1, 32>}, {pipeline_mode = #tpu.pipeline_mode<synchronous>, transform_indices = @transform_2, window_bounds = array<i64: 1, 32>}, {pipeline_mode = #tpu.pipeline_mode<synchronous>, transform_indices = @transform_3, window_bounds = array<i64: 32, 96>}, {pipeline_mode = #tpu.pipeline_mode<synchronous>, transform_indices = @transform_4, window_bounds = array<i64: 32, 32>}, {pipeline_mode = #tpu.pipeline_mode<synchronous>, transform_indices = @transform_5, window_bounds = array<i64: 1, 32>}, {pipeline_mode = #tpu.pipeline_mode<synchronous>, transform_indices = @transform_6, window_bounds = array<i64: 1, 32>}, {pipeline_mode = #tpu.pipeline_mode<synchronous>, transform_indices = @transform_7, window_bounds = array<i64: 1, 32>}, {pipeline_mode = #tpu.pipeline_mode<synchronous>, transform_indices = @transform_8, window_bounds = array<i64: 32, 128>}, {pipeline_mode = #tpu.pipeline_mode<synchronous>, transform_indices = @transform_9, window_bounds = array<i64: 1, 128>}, {pipeline_mode = #tpu.pipeline_mode<synchronous>, transform_indices = @transform_10, window_bounds = array<i64: 128, 32>}, {pipeline_mode = #tpu.pipeline_mode<synchronous>, transform_indices = @transform_11, window_bounds = array<i64: 1, 32>}, {transform_indices = @transform_12, window_bounds = array<i64: 1, 8, 32>}, {transform_indices = @transform_13, window_bounds = array<i64: 1, 4, 8, 8>}]} {
    %c0 = arith.constant 0 : index
    %c0_0 = arith.constant 0 : index
    %c0_1 = arith.constant 0 : index
    %0 = vector.load %arg1[%c0, %c0_0, %c0_1] : memref<1x8x32xf32, #tpu.memory_space<vmem>>, vector<1x8x32xf32>
    %1 = vector.shape_cast %0 : vector<1x8x32xf32> to vector<8x32xf32>
    %c0_2 = arith.constant 0 : index
    %c0_3 = arith.constant 0 : index
    %2 = vector.load %arg2[%c0_2, %c0_3] : memref<1x32xf32, #tpu.memory_space<vmem>>, vector<1x32xf32>
    %c0_4 = arith.constant 0 : index
    %c0_5 = arith.constant 0 : index
    %3 = vector.load %arg3[%c0_4, %c0_5] : memref<1x32xf32, #tpu.memory_space<vmem>>, vector<1x32xf32>
    %cst = arith.constant dense<0.000000e+00> : vector<8xf32>
    %4 = vector.multi_reduction <add>, %1, %cst [1] : vector<8x32xf32> to vector<8xf32>
    %5 = vector.shape_cast %4 : vector<8xf32> to vector<8x1xf32>
    %cst_6 = arith.constant 3.200000e+01 : f32
    %6 = vector.broadcast %cst_6 : f32 to vector<8x1xf32>
    %7 = arith.divf %5, %6 : vector<8x1xf32>
    %8 = vector.broadcast %7 : vector<8x1xf32> to vector<8x32xf32>
    %9 = arith.subf %1, %8 : vector<8x32xf32>
    %10 = arith.mulf %9, %9 : vector<8x32xf32>
    %cst_7 = arith.constant dense<0.000000e+00> : vector<8xf32>
    %11 = vector.multi_reduction <add>, %10, %cst_7 [1] : vector<8x32xf32> to vector<8xf32>
    %12 = vector.shape_cast %11 : vector<8xf32> to vector<8x1xf32>
    %cst_8 = arith.constant 3.200000e+01 : f32
    %13 = vector.broadcast %cst_8 : f32 to vector<8x1xf32>
    %14 = arith.divf %12, %13 : vector<8x1xf32>
    %15 = vector.broadcast %7 : vector<8x1xf32> to vector<8x32xf32>
    %16 = arith.subf %1, %15 : vector<8x32xf32>
    %cst_9 = arith.constant 9.99999974E-6 : f32
    %17 = vector.broadcast %cst_9 : f32 to vector<8x1xf32>
    %18 = arith.addf %14, %17 : vector<8x1xf32>
    %19 = math.rsqrt %18 : vector<8x1xf32>
    %20 = vector.broadcast %19 : vector<8x1xf32> to vector<8x32xf32>
    %21 = arith.mulf %16, %20 : vector<8x32xf32>
    %22 = vector.broadcast %2 : vector<1x32xf32> to vector<8x32xf32>
    %23 = arith.mulf %21, %22 : vector<8x32xf32>
    %24 = vector.broadcast %3 : vector<1x32xf32> to vector<8x32xf32>
    %25 = arith.addf %23, %24 : vector<8x32xf32>
    %c0_10 = arith.constant 0 : index
    %c0_11 = arith.constant 0 : index
    %26 = vector.load %arg4[%c0_10, %c0_11] : memref<32x96xf32, #tpu.memory_space<vmem>>, vector<32x96xf32>
    %cst_12 = arith.constant dense<0.000000e+00> : vector<8x96xf32>
    %27 = tpu.matmul %25, %26, %cst_12 {dimension_numbers = #tpu.dot_dimension_numbers<[1], [0], [0], [1], [0, 0, 1, 1], [], []>} : vector<8x32xf32>, vector<32x96xf32>, vector<8x96xf32> -> vector<8x96xf32>
    %28 = vector.extract_strided_slice %27 {offsets = [0, 0], sizes = [8, 8], strides = [1, 1]} : vector<8x96xf32> to vector<8x8xf32>
    %29 = vector.extract_strided_slice %27 {offsets = [0, 32], sizes = [8, 8], strides = [1, 1]} : vector<8x96xf32> to vector<8x8xf32>
    %30 = vector.extract_strided_slice %27 {offsets = [0, 64], sizes = [8, 8], strides = [1, 1]} : vector<8x96xf32> to vector<8x8xf32>
    %cst_13 = arith.constant dense<0.000000e+00> : vector<8x8xf32>
    %31 = tpu.matmul %28, %29, %cst_13 {dimension_numbers = #tpu.dot_dimension_numbers<[1], [1], [0], [0], [0, 0, 1, 0], [], []>} : vector<8x8xf32>, vector<8x8xf32>, vector<8x8xf32> -> vector<8x8xf32>
    %cst_14 = arith.constant dense<0xFF800000> : vector<8xf32>
    %32 = vector.multi_reduction <maximumf>, %31, %cst_14 [1] : vector<8x8xf32> to vector<8xf32>
    %33 = vector.shape_cast %32 : vector<8xf32> to vector<8x1xf32>
    %34 = vector.broadcast %33 : vector<8x1xf32> to vector<8x8xf32>
    %35 = arith.subf %31, %34 : vector<8x8xf32>
    %36 = math.exp %35 : vector<8x8xf32>
    %cst_15 = arith.constant dense<0.000000e+00> : vector<8xf32>
    %37 = vector.multi_reduction <add>, %36, %cst_15 [1] : vector<8x8xf32> to vector<8xf32>
    %38 = vector.shape_cast %37 : vector<8xf32> to vector<8x1xf32>
    %39 = tpu.reciprocal %38 : vector<8x1xf32> -> vector<8x1xf32>
    %40 = vector.broadcast %39 : vector<8x1xf32> to vector<8x8xf32>
    %41 = arith.mulf %36, %40 : vector<8x8xf32>
    %c0_16 = arith.constant 0 : index
    %c0_17 = arith.constant 0 : index
    %c0_18 = arith.constant 0 : index
    %c0_19 = arith.constant 0 : index
    %42 = vector.load %arg14[%c0_16, %c0_17, %c0_18, %c0_19] : memref<1x4x8x8xf32, #tpu.memory_space<vmem>>, vector<1x1x8x8xf32>
    %43 = vector.shape_cast %42 : vector<1x1x8x8xf32> to vector<8x8xf32>
    %44 = vector.shape_cast %41 : vector<8x8xf32> to vector<1x1x8x8xf32>
    tpu.vector_store %arg14[%c0_16, %c0_17, %c0_18, %c0_19], %44 {strides = array<i32>} : memref<1x4x8x8xf32, #tpu.memory_space<vmem>>, vector<1x1x8x8xf32>,
    %cst_20 = arith.constant dense<0.000000e+00> : vector<8x8xf32>
    %45 = tpu.matmul %41, %30, %cst_20 {dimension_numbers = #tpu.dot_dimension_numbers<[1], [0], [0], [1], [0, 0, 1, 1], [], []>} : vector<8x8xf32>, vector<8x8xf32>, vector<8x8xf32> -> vector<8x8xf32>
    %46 = vector.extract_strided_slice %27 {offsets = [0, 8], sizes = [8, 8], strides = [1, 1]} : vector<8x96xf32> to vector<8x8xf32>
    %47 = vector.extract_strided_slice %27 {offsets = [0, 40], sizes = [8, 8], strides = [1, 1]} : vector<8x96xf32> to vector<8x8xf32>
    %48 = vector.extract_strided_slice %27 {offsets = [0, 72], sizes = [8, 8], strides = [1, 1]} : vector<8x96xf32> to vector<8x8xf32>
    %cst_21 = arith.constant dense<0.000000e+00> : vector<8x8xf32>
    %49 = tpu.matmul %46, %47, %cst_21 {dimension_numbers = #tpu.dot_dimension_numbers<[1], [1], [0], [0], [0, 0, 1, 0], [], []>} : vector<8x8xf32>, vector<8x8xf32>, vector<8x8xf32> -> vector<8x8xf32>
    %cst_22 = arith.constant dense<0xFF800000> : vector<8xf32>
    %50 = vector.multi_reduction <maximumf>, %49, %cst_22 [1] : vector<8x8xf32> to vector<8xf32>
    %51 = vector.shape_cast %50 : vector<8xf32> to vector<8x1xf32>
    %52 = vector.broadcast %51 : vector<8x1xf32> to vector<8x8xf32>
    %53 = arith.subf %49, %52 : vector<8x8xf32>
    %54 = math.exp %53 : vector<8x8xf32>
    %cst_23 = arith.constant dense<0.000000e+00> : vector<8xf32>
    %55 = vector.multi_reduction <add>, %54, %cst_23 [1] : vector<8x8xf32> to vector<8xf32>
    %56 = vector.shape_cast %55 : vector<8xf32> to vector<8x1xf32>
    %57 = tpu.reciprocal %56 : vector<8x1xf32> -> vector<8x1xf32>
    %58 = vector.broadcast %57 : vector<8x1xf32> to vector<8x8xf32>
    %59 = arith.mulf %54, %58 : vector<8x8xf32>
    %c0_24 = arith.constant 0 : index
    %c1 = arith.constant 1 : index
    %c0_25 = arith.constant 0 : index
    %c0_26 = arith.constant 0 : index
    %60 = vector.load %arg14[%c0_24, %c1, %c0_25, %c0_26] : memref<1x4x8x8xf32, #tpu.memory_space<vmem>>, vector<1x1x8x8xf32>
    %61 = vector.shape_cast %60 : vector<1x1x8x8xf32> to vector<8x8xf32>
    %62 = vector.shape_cast %59 : vector<8x8xf32> to vector<1x1x8x8xf32>
    tpu.vector_store %arg14[%c0_24, %c1, %c0_25, %c0_26], %62 {strides = array<i32>} : memref<1x4x8x8xf32, #tpu.memory_space<vmem>>, vector<1x1x8x8xf32>,
    %cst_27 = arith.constant dense<0.000000e+00> : vector<8x8xf32>
    %63 = tpu.matmul %59, %48, %cst_27 {dimension_numbers = #tpu.dot_dimension_numbers<[1], [0], [0], [1], [0, 0, 1, 1], [], []>} : vector<8x8xf32>, vector<8x8xf32>, vector<8x8xf32> -> vector<8x8xf32>
    %64 = tpu.concatenate %45, %63 in 1 : vector<8x8xf32>, vector<8x8xf32> -> vector<8x16xf32>
    %c0_28 = arith.constant 0 : index
    %c0_29 = arith.constant 0 : index
    %65 = vector.load %arg15[%c0_28, %c0_29] : memref<8x32xf32, #tpu.memory_space<vmem>>, vector<8x16xf32>
    tpu.vector_store %arg15[%c0_28, %c0_29], %64 {strides = array<i32>} : memref<8x32xf32, #tpu.memory_space<vmem>>, vector<8x16xf32>,
    %66 = vector.extract_strided_slice %27 {offsets = [0, 16], sizes = [8, 8], strides = [1, 1]} : vector<8x96xf32> to vector<8x8xf32>
    %67 = vector.extract_strided_slice %27 {offsets = [0, 48], sizes = [8, 8], strides = [1, 1]} : vector<8x96xf32> to vector<8x8xf32>
    %68 = vector.extract_strided_slice %27 {offsets = [0, 80], sizes = [8, 8], strides = [1, 1]} : vector<8x96xf32> to vector<8x8xf32>
    %cst_30 = arith.constant dense<0.000000e+00> : vector<8x8xf32>
    %69 = tpu.matmul %66, %67, %cst_30 {dimension_numbers = #tpu.dot_dimension_numbers<[1], [1], [0], [0], [0, 0, 1, 0], [], []>} : vector<8x8xf32>, vector<8x8xf32>, vector<8x8xf32> -> vector<8x8xf32>
    %cst_31 = arith.constant dense<0xFF800000> : vector<8xf32>
    %70 = vector.multi_reduction <maximumf>, %69, %cst_31 [1] : vector<8x8xf32> to vector<8xf32>
    %71 = vector.shape_cast %70 : vector<8xf32> to vector<8x1xf32>
    %72 = vector.broadcast %71 : vector<8x1xf32> to vector<8x8xf32>
    %73 = arith.subf %69, %72 : vector<8x8xf32>
    %74 = math.exp %73 : vector<8x8xf32>
    %cst_32 = arith.constant dense<0.000000e+00> : vector<8xf32>
    %75 = vector.multi_reduction <add>, %74, %cst_32 [1] : vector<8x8xf32> to vector<8xf32>
    %76 = vector.shape_cast %75 : vector<8xf32> to vector<8x1xf32>
    %77 = tpu.reciprocal %76 : vector<8x1xf32> -> vector<8x1xf32>
    %78 = vector.broadcast %77 : vector<8x1xf32> to vector<8x8xf32>
    %79 = arith.mulf %74, %78 : vector<8x8xf32>
    %c0_33 = arith.constant 0 : index
    %c2 = arith.constant 2 : index
    %c0_34 = arith.constant 0 : index
    %c0_35 = arith.constant 0 : index
    %80 = vector.load %arg14[%c0_33, %c2, %c0_34, %c0_35] : memref<1x4x8x8xf32, #tpu.memory_space<vmem>>, vector<1x1x8x8xf32>
    %81 = vector.shape_cast %80 : vector<1x1x8x8xf32> to vector<8x8xf32>
    %82 = vector.shape_cast %79 : vector<8x8xf32> to vector<1x1x8x8xf32>
    tpu.vector_store %arg14[%c0_33, %c2, %c0_34, %c0_35], %82 {strides = array<i32>} : memref<1x4x8x8xf32, #tpu.memory_space<vmem>>, vector<1x1x8x8xf32>,
    %cst_36 = arith.constant dense<0.000000e+00> : vector<8x8xf32>
    %83 = tpu.matmul %79, %68, %cst_36 {dimension_numbers = #tpu.dot_dimension_numbers<[1], [0], [0], [1], [0, 0, 1, 1], [], []>} : vector<8x8xf32>, vector<8x8xf32>, vector<8x8xf32> -> vector<8x8xf32>
    %84 = vector.extract_strided_slice %27 {offsets = [0, 24], sizes = [8, 8], strides = [1, 1]} : vector<8x96xf32> to vector<8x8xf32>
    %85 = vector.extract_strided_slice %27 {offsets = [0, 56], sizes = [8, 8], strides = [1, 1]} : vector<8x96xf32> to vector<8x8xf32>
    %86 = vector.extract_strided_slice %27 {offsets = [0, 88], sizes = [8, 8], strides = [1, 1]} : vector<8x96xf32> to vector<8x8xf32>
    %cst_37 = arith.constant dense<0.000000e+00> : vector<8x8xf32>
    %87 = tpu.matmul %84, %85, %cst_37 {dimension_numbers = #tpu.dot_dimension_numbers<[1], [1], [0], [0], [0, 0, 1, 0], [], []>} : vector<8x8xf32>, vector<8x8xf32>, vector<8x8xf32> -> vector<8x8xf32>
    %cst_38 = arith.constant dense<0xFF800000> : vector<8xf32>
    %88 = vector.multi_reduction <maximumf>, %87, %cst_38 [1] : vector<8x8xf32> to vector<8xf32>
    %89 = vector.shape_cast %88 : vector<8xf32> to vector<8x1xf32>
    %90 = vector.broadcast %89 : vector<8x1xf32> to vector<8x8xf32>
    %91 = arith.subf %87, %90 : vector<8x8xf32>
    %92 = math.exp %91 : vector<8x8xf32>
    %cst_39 = arith.constant dense<0.000000e+00> : vector<8xf32>
    %93 = vector.multi_reduction <add>, %92, %cst_39 [1] : vector<8x8xf32> to vector<8xf32>
    %94 = vector.shape_cast %93 : vector<8xf32> to vector<8x1xf32>
    %95 = tpu.reciprocal %94 : vector<8x1xf32> -> vector<8x1xf32>
    %96 = vector.broadcast %95 : vector<8x1xf32> to vector<8x8xf32>
    %97 = arith.mulf %92, %96 : vector<8x8xf32>
    %c0_40 = arith.constant 0 : index
    %c3 = arith.constant 3 : index
    %c0_41 = arith.constant 0 : index
    %c0_42 = arith.constant 0 : index
    %98 = vector.load %arg14[%c0_40, %c3, %c0_41, %c0_42] : memref<1x4x8x8xf32, #tpu.memory_space<vmem>>, vector<1x1x8x8xf32>
    %99 = vector.shape_cast %98 : vector<1x1x8x8xf32> to vector<8x8xf32>
    %100 = vector.shape_cast %97 : vector<8x8xf32> to vector<1x1x8x8xf32>
    tpu.vector_store %arg14[%c0_40, %c3, %c0_41, %c0_42], %100 {strides = array<i32>} : memref<1x4x8x8xf32, #tpu.memory_space<vmem>>, vector<1x1x8x8xf32>,
    %cst_43 = arith.constant dense<0.000000e+00> : vector<8x8xf32>
    %101 = tpu.matmul %97, %86, %cst_43 {dimension_numbers = #tpu.dot_dimension_numbers<[1], [0], [0], [1], [0, 0, 1, 1], [], []>} : vector<8x8xf32>, vector<8x8xf32>, vector<8x8xf32> -> vector<8x8xf32>
    %102 = tpu.concatenate %83, %101 in 1 : vector<8x8xf32>, vector<8x8xf32> -> vector<8x16xf32>
    %c0_44 = arith.constant 0 : index
    %c16 = arith.constant 16 : index
    %103 = vector.load %arg15[%c0_44, %c16] : memref<8x32xf32, #tpu.memory_space<vmem>>, vector<8x16xf32>
    tpu.vector_store %arg15[%c0_44, %c16], %102 {strides = array<i32>} : memref<8x32xf32, #tpu.memory_space<vmem>>, vector<8x16xf32>,
    %c0_45 = arith.constant 0 : index
    %c0_46 = arith.constant 0 : index
    %104 = vector.load %arg15[%c0_45, %c0_46] : memref<8x32xf32, #tpu.memory_space<vmem>>, vector<8x32xf32>
    %c0_47 = arith.constant 0 : index
    %c0_48 = arith.constant 0 : index
    %105 = vector.load %arg5[%c0_47, %c0_48] : memref<32x32xf32, #tpu.memory_space<vmem>>, vector<32x32xf32>
    %cst_49 = arith.constant dense<0.000000e+00> : vector<8x32xf32>
    %106 = tpu.matmul %104, %105, %cst_49 {dimension_numbers = #tpu.dot_dimension_numbers<[1], [0], [0], [1], [0, 0, 1, 1], [], []>} : vector<8x32xf32>, vector<32x32xf32>, vector<8x32xf32> -> vector<8x32xf32>
    %c0_50 = arith.constant 0 : index
    %c0_51 = arith.constant 0 : index
    %107 = vector.load %arg6[%c0_50, %c0_51] : memref<1x32xf32, #tpu.memory_space<vmem>>, vector<1x32xf32>
    %108 = vector.broadcast %107 : vector<1x32xf32> to vector<8x32xf32>
    %109 = arith.addf %106, %108 : vector<8x32xf32>
    %110 = arith.addf %1, %109 : vector<8x32xf32>
    %c0_52 = arith.constant 0 : index
    %c0_53 = arith.constant 0 : index
    %111 = vector.load %arg7[%c0_52, %c0_53] : memref<1x32xf32, #tpu.memory_space<vmem>>, vector<1x32xf32>
    %c0_54 = arith.constant 0 : index
    %c0_55 = arith.constant 0 : index
    %112 = vector.load %arg8[%c0_54, %c0_55] : memref<1x32xf32, #tpu.memory_space<vmem>>, vector<1x32xf32>
    %cst_56 = arith.constant dense<0.000000e+00> : vector<8xf32>
    %113 = vector.multi_reduction <add>, %110, %cst_56 [1] : vector<8x32xf32> to vector<8xf32>
    %114 = vector.shape_cast %113 : vector<8xf32> to vector<8x1xf32>
    %cst_57 = arith.constant 3.200000e+01 : f32
    %115 = vector.broadcast %cst_57 : f32 to vector<8x1xf32>
    %116 = arith.divf %114, %115 : vector<8x1xf32>
    %117 = vector.broadcast %116 : vector<8x1xf32> to vector<8x32xf32>
    %118 = arith.subf %110, %117 : vector<8x32xf32>
    %119 = arith.mulf %118, %118 : vector<8x32xf32>
    %cst_58 = arith.constant dense<0.000000e+00> : vector<8xf32>
    %120 = vector.multi_reduction <add>, %119, %cst_58 [1] : vector<8x32xf32> to vector<8xf32>
    %121 = vector.shape_cast %120 : vector<8xf32> to vector<8x1xf32>
    %cst_59 = arith.constant 3.200000e+01 : f32
    %122 = vector.broadcast %cst_59 : f32 to vector<8x1xf32>
    %123 = arith.divf %121, %122 : vector<8x1xf32>
    %124 = vector.broadcast %116 : vector<8x1xf32> to vector<8x32xf32>
    %125 = arith.subf %110, %124 : vector<8x32xf32>
    %cst_60 = arith.constant 9.99999974E-6 : f32
    %126 = vector.broadcast %cst_60 : f32 to vector<8x1xf32>
    %127 = arith.addf %123, %126 : vector<8x1xf32>
    %128 = math.rsqrt %127 : vector<8x1xf32>
    %129 = vector.broadcast %128 : vector<8x1xf32> to vector<8x32xf32>
    %130 = arith.mulf %125, %129 : vector<8x32xf32>
    %131 = vector.broadcast %111 : vector<1x32xf32> to vector<8x32xf32>
    %132 = arith.mulf %130, %131 : vector<8x32xf32>
    %133 = vector.broadcast %112 : vector<1x32xf32> to vector<8x32xf32>
    %134 = arith.addf %132, %133 : vector<8x32xf32>
    %c0_61 = arith.constant 0 : index
    %c0_62 = arith.constant 0 : index
    %135 = vector.load %arg9[%c0_61, %c0_62] : memref<32x128xf32, #tpu.memory_space<vmem>>, vector<32x128xf32>
    %cst_63 = arith.constant dense<0.000000e+00> : vector<8x128xf32>
    %136 = tpu.matmul %134, %135, %cst_63 {dimension_numbers = #tpu.dot_dimension_numbers<[1], [0], [0], [1], [0, 0, 1, 1], [], []>} : vector<8x32xf32>, vector<32x128xf32>, vector<8x128xf32> -> vector<8x128xf32>
    %c0_64 = arith.constant 0 : index
    %c0_65 = arith.constant 0 : index
    %137 = vector.load %arg10[%c0_64, %c0_65] : memref<1x128xf32, #tpu.memory_space<vmem>>, vector<1x128xf32>
    %138 = vector.broadcast %137 : vector<1x128xf32> to vector<8x128xf32>
    %139 = arith.addf %136, %138 : vector<8x128xf32>
    %cst_66 = arith.constant 5.000000e-01 : f32
    %140 = vector.broadcast %cst_66 : f32 to vector<8x128xf32>
    %141 = arith.mulf %140, %139 : vector<8x128xf32>
    %cst_67 = arith.constant 0.707106769 : f32
    %142 = vector.broadcast %cst_67 : f32 to vector<8x128xf32>
    %143 = arith.mulf %139, %142 : vector<8x128xf32>
    %144 = math.erf %143 : vector<8x128xf32>
    %cst_68 = arith.constant 1.000000e+00 : f32
    %145 = vector.broadcast %cst_68 : f32 to vector<8x128xf32>
    %146 = arith.addf %145, %144 : vector<8x128xf32>
    %147 = arith.mulf %141, %146 : vector<8x128xf32>
    %c0_69 = arith.constant 0 : index
    %c0_70 = arith.constant 0 : index
    %148 = vector.load %arg11[%c0_69, %c0_70] : memref<128x32xf32, #tpu.memory_space<vmem>>, vector<128x32xf32>
    %cst_71 = arith.constant dense<0.000000e+00> : vector<8x32xf32>
    %149 = tpu.matmul %147, %148, %cst_71 {dimension_numbers = #tpu.dot_dimension_numbers<[1], [0], [0], [1], [0, 0, 1, 1], [], []>} : vector<8x128xf32>, vector<128x32xf32>, vector<8x32xf32> -> vector<8x32xf32>
    %c0_72 = arith.constant 0 : index
    %c0_73 = arith.constant 0 : index
    %150 = vector.load %arg12[%c0_72, %c0_73] : memref<1x32xf32, #tpu.memory_space<vmem>>, vector<1x32xf32>
    %151 = vector.broadcast %150 : vector<1x32xf32> to vector<8x32xf32>
    %152 = arith.addf %149, %151 : vector<8x32xf32>
    %153 = arith.addf %110, %152 : vector<8x32xf32>
    %c0_74 = arith.constant 0 : index
    %c0_75 = arith.constant 0 : index
    %c0_76 = arith.constant 0 : index
    %154 = vector.load %arg13[%c0_74, %c0_75, %c0_76] : memref<1x8x32xf32, #tpu.memory_space<vmem>>, vector<1x8x32xf32>
    %155 = vector.shape_cast %154 : vector<1x8x32xf32> to vector<8x32xf32>
    %156 = vector.shape_cast %153 : vector<8x32xf32> to vector<1x8x32xf32>
    tpu.vector_store %arg13[%c0_74, %c0_75, %c0_76], %156 {strides = array<i32>} : memref<1x8x32xf32, #tpu.memory_space<vmem>>, vector<1x8x32xf32>,
    return
  }
  func.func @transform_0(%arg0: i32) -> (i32, i32, i32) {
    %c0_i32 = arith.constant 0 : i32
    %c0_i32_0 = arith.constant 0 : i32
    %c0_i32_1 = arith.constant 0 : i32
    return %arg0, %c0_i32, %c0_i32_0 : i32, i32, i32
  }
  func.func @transform_1(%arg0: i32) -> (i32, i32) {
    %c0_i32 = arith.constant 0 : i32
    %c0_i32_0 = arith.constant 0 : i32
    %c0_i32_1 = arith.constant 0 : i32
    return %c0_i32, %c0_i32_0 : i32, i32
  }
  func.func @transform_2(%arg0: i32) -> (i32, i32) {
    %c0_i32 = arith.constant 0 : i32
    %c0_i32_0 = arith.constant 0 : i32
    %c0_i32_1 = arith.constant 0 : i32
    return %c0_i32, %c0_i32_0 : i32, i32
  }
  func.func @transform_3(%arg0: i32) -> (i32, i32) {
    %c0_i32 = arith.constant 0 : i32
    %c0_i32_0 = arith.constant 0 : i32
    %c0_i32_1 = arith.constant 0 : i32
    return %c0_i32, %c0_i32_0 : i32, i32
  }
  func.func @transform_4(%arg0: i32) -> (i32, i32) {
    %c0_i32 = arith.constant 0 : i32
    %c0_i32_0 = arith.constant 0 : i32
    %c0_i32_1 = arith.constant 0 : i32
    return %c0_i32, %c0_i32_0 : i32, i32
  }
  func.func @transform_5(%arg0: i32) -> (i32, i32) {
    %c0_i32 = arith.constant 0 : i32
    %c0_i32_0 = arith.constant 0 : i32
    %c0_i32_1 = arith.constant 0 : i32
    return %c0_i32, %c0_i32_0 : i32, i32
  }
  func.func @transform_6(%arg0: i32) -> (i32, i32) {
    %c0_i32 = arith.constant 0 : i32
    %c0_i32_0 = arith.constant 0 : i32
    %c0_i32_1 = arith.constant 0 : i32
    return %c0_i32, %c0_i32_0 : i32, i32
  }
  func.func @transform_7(%arg0: i32) -> (i32, i32) {
    %c0_i32 = arith.constant 0 : i32
    %c0_i32_0 = arith.constant 0 : i32
    %c0_i32_1 = arith.constant 0 : i32
    return %c0_i32, %c0_i32_0 : i32, i32
  }
  func.func @transform_8(%arg0: i32) -> (i32, i32) {
    %c0_i32 = arith.constant 0 : i32
    %c0_i32_0 = arith.constant 0 : i32
    %c0_i32_1 = arith.constant 0 : i32
    return %c0_i32, %c0_i32_0 : i32, i32
  }
  func.func @transform_9(%arg0: i32) -> (i32, i32) {
    %c0_i32 = arith.constant 0 : i32
    %c0_i32_0 = arith.constant 0 : i32
    %c0_i32_1 = arith.constant 0 : i32
    return %c0_i32, %c0_i32_0 : i32, i32
  }
  func.func @transform_10(%arg0: i32) -> (i32, i32) {
    %c0_i32 = arith.constant 0 : i32
    %c0_i32_0 = arith.constant 0 : i32
    %c0_i32_1 = arith.constant 0 : i32
    return %c0_i32, %c0_i32_0 : i32, i32
  }
  func.func @transform_11(%arg0: i32) -> (i32, i32) {
    %c0_i32 = arith.constant 0 : i32
    %c0_i32_0 = arith.constant 0 : i32
    %c0_i32_1 = arith.constant 0 : i32
    return %c0_i32, %c0_i32_0 : i32, i32
  }
  func.func @transform_12(%arg0: i32) -> (i32, i32, i32) {
    %c0_i32 = arith.constant 0 : i32
    %c0_i32_0 = arith.constant 0 : i32
    %c0_i32_1 = arith.constant 0 : i32
    return %arg0, %c0_i32, %c0_i32_0 : i32, i32, i32
  }
  func.func @transform_13(%arg0: i32) -> (i32, i32, i32, i32) {
    %c0_i32 = arith.constant 0 : i32
    %c0_i32_0 = arith.constant 0 : i32
    %c0_i32_1 = arith.constant 0 : i32
    %c0_i32_2 = arith.constant 0 : i32
    return %arg0, %c0_i32, %c0_i32_0, %c0_i32_1 : i32, i32, i32, i32
  }
}

module attributes {stable_mosaic.version = 11 : i64} {
  func.func @_block_kernel(%arg0: i32, %arg1: memref<1x8x32xf32, #tpu.memory_space<vmem>>, %arg2: memref<1x32xf32, #tpu.memory_space<vmem>>, %arg3: memref<1x32xf32, #tpu.memory_space<vmem>>, %arg4: memref<32x96xf32, #tpu.memory_space<vmem>>, %arg5: memref<32x32xf32, #tpu.memory_space<vmem>>, %arg6: memref<1x32xf32, #tpu.memory_space<vmem>>, %arg7: memref<1x32xf32, #tpu.memory_space<vmem>>, %arg8: memref<1x32xf32, #tpu.memory_space<vmem>>, %arg9: memref<32x128xf32, #tpu.memory_space<vmem>>, %arg10: memref<1x128xf32, #tpu.memory_space<vmem>>, %arg11: memref<128x32xf32, #tpu.memory_space<vmem>>, %arg12: memref<1x32xf32, #tpu.memory_space<vmem>>, %arg13: memref<1x8x32xf32, #tpu.memory_space<vmem>>, %arg14: memref<1x4x8x8xf32, #tpu.memory_space<vmem>>, %arg15: memref<8x32xf32, #tpu.memory_space<vmem>>) attributes {dimension_semantics = [#tpu.dimension_semantics<parallel>], iteration_bounds = array<i64: 2>, scalar_prefetch = 0 : i64, scratch_operands = 1 : i64, tpu.core_type = #tpu.core_type<tc>, window_params = [{transform_indices = @transform_0, window_bounds = array<i64: 1, 8, 32>}, {pipeline_mode = #tpu.pipeline_mode<synchronous>, transform_indices = @transform_1, window_bounds = array<i64: 1, 32>}, {pipeline_mode = #tpu.pipeline_mode<synchronous>, transform_indices = @transform_2, window_bounds = array<i64: 1, 32>}, {pipeline_mode = #tpu.pipeline_mode<synchronous>, transform_indices = @transform_3, window_bounds = array<i64: 32, 96>}, {pipeline_mode = #tpu.pipeline_mode<synchronous>, transform_indices = @transform_4, window_bounds = array<i64: 32, 32>}, {pipeline_mode = #tpu.pipeline_mode<synchronous>, transform_indices = @transform_5, window_bounds = array<i64: 1, 32>}, {pipeline_mode = #tpu.pipeline_mode<synchronous>, transform_indices = @transform_6, window_bounds = array<i64: 1, 32>}, {pipeline_mode = #tpu.pipeline_mode<synchronous>, transform_indices = @transform_7, window_bounds = array<i64: 1, 32>}, {pipeline_mode = #tpu.pipeline_mode<synchronous>, transform_indices = @transform_8, window_bounds = array<i64: 32, 128>}, {pipeline_mode = #tpu.pipeline_mode<synchronous>, transform_indices = @transform_9, window_bounds = array<i64: 1, 128>}, {pipeline_mode = #tpu.pipeline_mode<synchronous>, transform_indices = @transform_10, window_bounds = array<i64: 128, 32>}, {pipeline_mode = #tpu.pipeline_mode<synchronous>, transform_indices = @transform_11, window_bounds = array<i64: 1, 32>}, {transform_indices = @transform_12, window_bounds = array<i64: 1, 8, 32>}, {transform_indices = @transform_13, window_bounds = array<i64: 1, 4, 8, 8>}]} {
    %c0 = arith.constant 0 : index
    %c0_0 = arith.constant 0 : index
    %c0_1 = arith.constant 0 : index
    %0 = vector.load %arg1[%c0, %c0_0, %c0_1] : memref<1x8x32xf32, #tpu.memory_space<vmem>>, vector<1x8x32xf32>
    %1 = vector.shape_cast %0 : vector<1x8x32xf32> to vector<8x32xf32>
    %c0_2 = arith.constant 0 : index
    %c0_3 = arith.constant 0 : index
    %2 = vector.load %arg2[%c0_2, %c0_3] : memref<1x32xf32, #tpu.memory_space<vmem>>, vector<1x32xf32>
    %c0_4 = arith.constant 0 : index
    %c0_5 = arith.constant 0 : index
    %3 = vector.load %arg3[%c0_4, %c0_5] : memref<1x32xf32, #tpu.memory_space<vmem>>, vector<1x32xf32>
    %cst = arith.constant dense<0.000000e+00> : vector<8xf32>
    %4 = vector.multi_reduction <add>, %1, %cst [1] : vector<8x32xf32> to vector<8xf32>
    %5 = vector.shape_cast %4 : vector<8xf32> to vector<8x1xf32>
    %cst_6 = arith.constant 3.200000e+01 : f32
    %6 = vector.broadcast %cst_6 : f32 to vector<8x1xf32>
    %7 = arith.divf %5, %6 : vector<8x1xf32>
    %8 = vector.broadcast %7 : vector<8x1xf32> to vector<8x32xf32>
    %9 = arith.subf %1, %8 : vector<8x32xf32>
    %10 = arith.mulf %9, %9 : vector<8x32xf32>
    %cst_7 = arith.constant dense<0.000000e+00> : vector<8xf32>
    %11 = vector.multi_reduction <add>, %10, %cst_7 [1] : vector<8x32xf32> to vector<8xf32>
    %12 = vector.shape_cast %11 : vector<8xf32> to vector<8x1xf32>
    %cst_8 = arith.constant 3.200000e+01 : f32
    %13 = vector.broadcast %cst_8 : f32 to vector<8x1xf32>
    %14 = arith.divf %12, %13 : vector<8x1xf32>
    %15 = vector.broadcast %7 : vector<8x1xf32> to vector<8x32xf32>
    %16 = arith.subf %1, %15 : vector<8x32xf32>
    %cst_9 = arith.constant 9.99999974E-6 : f32
    %17 = vector.broadcast %cst_9 : f32 to vector<8x1xf32>
    %18 = arith.addf %14, %17 : vector<8x1xf32>
    %19 = math.rsqrt %18 : vector<8x1xf32>
    %20 = vector.broadcast %19 : vector<8x1xf32> to vector<8x32xf32>
    %21 = arith.mulf %16, %20 : vector<8x32xf32>
    %22 = vector.broadcast %2 : vector<1x32xf32> to vector<8x32xf32>
    %23 = arith.mulf %21, %22 : vector<8x32xf32>
    %24 = vector.broadcast %3 : vector<1x32xf32> to vector<8x32xf32>
    %25 = arith.addf %23, %24 : vector<8x32xf32>
    %c0_10 = arith.constant 0 : index
    %c0_11 = arith.constant 0 : index
    %26 = vector.load %arg4[%c0_10, %c0_11] : memref<32x96xf32, #tpu.memory_space<vmem>>, vector<32x96xf32>
    %cst_12 = arith.constant dense<0.000000e+00> : vector<8x96xf32>
    %27 = tpu.matmul %25, %26, %cst_12 {dimension_numbers = #tpu.dot_dimension_numbers<[1], [0], [0], [1], [0, 0, 1, 1], [], []>} : vector<8x32xf32>, vector<32x96xf32>, vector<8x96xf32> -> vector<8x96xf32>
    %28 = vector.extract_strided_slice %27 {offsets = [0, 0], sizes = [8, 8], strides = [1, 1]} : vector<8x96xf32> to vector<8x8xf32>
    %29 = vector.extract_strided_slice %27 {offsets = [0, 32], sizes = [8, 8], strides = [1, 1]} : vector<8x96xf32> to vector<8x8xf32>
    %30 = vector.extract_strided_slice %27 {offsets = [0, 64], sizes = [8, 8], strides = [1, 1]} : vector<8x96xf32> to vector<8x8xf32>
    %cst_13 = arith.constant dense<0.000000e+00> : vector<8x8xf32>
    %31 = tpu.matmul %28, %29, %cst_13 {dimension_numbers = #tpu.dot_dimension_numbers<[1], [1], [0], [0], [0, 0, 1, 0], [], []>} : vector<8x8xf32>, vector<8x8xf32>, vector<8x8xf32> -> vector<8x8xf32>
    %cst_14 = arith.constant dense<0xFF800000> : vector<8xf32>
    %32 = vector.multi_reduction <maximumf>, %31, %cst_14 [1] : vector<8x8xf32> to vector<8xf32>
    %33 = vector.shape_cast %32 : vector<8xf32> to vector<8x1xf32>
    %34 = vector.broadcast %33 : vector<8x1xf32> to vector<8x8xf32>
    %35 = arith.subf %31, %34 : vector<8x8xf32>
    %36 = math.exp %35 : vector<8x8xf32>
    %cst_15 = arith.constant dense<0.000000e+00> : vector<8xf32>
    %37 = vector.multi_reduction <add>, %36, %cst_15 [1] : vector<8x8xf32> to vector<8xf32>
    %38 = vector.shape_cast %37 : vector<8xf32> to vector<8x1xf32>
    %39 = tpu.reciprocal %38 : vector<8x1xf32> -> vector<8x1xf32>
    %40 = vector.broadcast %39 : vector<8x1xf32> to vector<8x8xf32>
    %41 = arith.mulf %36, %40 : vector<8x8xf32>
    %c0_16 = arith.constant 0 : index
    %c0_17 = arith.constant 0 : index
    %c0_18 = arith.constant 0 : index
    %c0_19 = arith.constant 0 : index
    %42 = vector.load %arg14[%c0_16, %c0_17, %c0_18, %c0_19] : memref<1x4x8x8xf32, #tpu.memory_space<vmem>>, vector<1x1x8x8xf32>
    %43 = vector.shape_cast %42 : vector<1x1x8x8xf32> to vector<8x8xf32>
    %44 = vector.shape_cast %41 : vector<8x8xf32> to vector<1x1x8x8xf32>
    tpu.vector_store %arg14[%c0_16, %c0_17, %c0_18, %c0_19], %44 {strides = array<i32>} : memref<1x4x8x8xf32, #tpu.memory_space<vmem>>, vector<1x1x8x8xf32>,
    %cst_20 = arith.constant dense<0.000000e+00> : vector<8x8xf32>
    %45 = tpu.matmul %41, %30, %cst_20 {dimension_numbers = #tpu.dot_dimension_numbers<[1], [0], [0], [1], [0, 0, 1, 1], [], []>} : vector<8x8xf32>, vector<8x8xf32>, vector<8x8xf32> -> vector<8x8xf32>
    %46 = vector.extract_strided_slice %27 {offsets = [0, 8], sizes = [8, 8], strides = [1, 1]} : vector<8x96xf32> to vector<8x8xf32>
    %47 = vector.extract_strided_slice %27 {offsets = [0, 40], sizes = [8, 8], strides = [1, 1]} : vector<8x96xf32> to vector<8x8xf32>
    %48 = vector.extract_strided_slice %27 {offsets = [0, 72], sizes = [8, 8], strides = [1, 1]} : vector<8x96xf32> to vector<8x8xf32>
    %cst_21 = arith.constant dense<0.000000e+00> : vector<8x8xf32>
    %49 = tpu.matmul %46, %47, %cst_21 {dimension_numbers = #tpu.dot_dimension_numbers<[1], [1], [0], [0], [0, 0, 1, 0], [], []>} : vector<8x8xf32>, vector<8x8xf32>, vector<8x8xf32> -> vector<8x8xf32>
    %cst_22 = arith.constant dense<0xFF800000> : vector<8xf32>
    %50 = vector.multi_reduction <maximumf>, %49, %cst_22 [1] : vector<8x8xf32> to vector<8xf32>
    %51 = vector.shape_cast %50 : vector<8xf32> to vector<8x1xf32>
    %52 = vector.broadcast %51 : vector<8x1xf32> to vector<8x8xf32>
    %53 = arith.subf %49, %52 : vector<8x8xf32>
    %54 = math.exp %53 : vector<8x8xf32>
    %cst_23 = arith.constant dense<0.000000e+00> : vector<8xf32>
    %55 = vector.multi_reduction <add>, %54, %cst_23 [1] : vector<8x8xf32> to vector<8xf32>
    %56 = vector.shape_cast %55 : vector<8xf32> to vector<8x1xf32>
    %57 = tpu.reciprocal %56 : vector<8x1xf32> -> vector<8x1xf32>
    %58 = vector.broadcast %57 : vector<8x1xf32> to vector<8x8xf32>
    %59 = arith.mulf %54, %58 : vector<8x8xf32>
    %c0_24 = arith.constant 0 : index
    %c1 = arith.constant 1 : index
    %c0_25 = arith.constant 0 : index
    %c0_26 = arith.constant 0 : index
    %60 = vector.load %arg14[%c0_24, %c1, %c0_25, %c0_26] : memref<1x4x8x8xf32, #tpu.memory_space<vmem>>, vector<1x1x8x8xf32>
    %61 = vector.shape_cast %60 : vector<1x1x8x8xf32> to vector<8x8xf32>
    %62 = vector.shape_cast %59 : vector<8x8xf32> to vector<1x1x8x8xf32>
    tpu.vector_store %arg14[%c0_24, %c1, %c0_25, %c0_26], %62 {strides = array<i32>} : memref<1x4x8x8xf32, #tpu.memory_space<vmem>>, vector<1x1x8x8xf32>,
    %cst_27 = arith.constant dense<0.000000e+00> : vector<8x8xf32>
    %63 = tpu.matmul %59, %48, %cst_27 {dimension_numbers = #tpu.dot_dimension_numbers<[1], [0], [0], [1], [0, 0, 1, 1], [], []>} : vector<8x8xf32>, vector<8x8xf32>, vector<8x8xf32> -> vector<8x8xf32>
    %64 = tpu.concatenate %45, %63 in 1 : vector<8x8xf32>, vector<8x8xf32> -> vector<8x16xf32>
    %c0_28 = arith.constant 0 : index
    %c0_29 = arith.constant 0 : index
    %65 = vector.load %arg15[%c0_28, %c0_29] : memref<8x32xf32, #tpu.memory_space<vmem>>, vector<8x16xf32>
    tpu.vector_store %arg15[%c0_28, %c0_29], %64 {strides = array<i32>} : memref<8x32xf32, #tpu.memory_space<vmem>>, vector<8x16xf32>,
    %66 = vector.extract_strided_slice %27 {offsets = [0, 16], sizes = [8, 8], strides = [1, 1]} : vector<8x96xf32> to vector<8x8xf32>
    %67 = vector.extract_strided_slice %27 {offsets = [0, 48], sizes = [8, 8], strides = [1, 1]} : vector<8x96xf32> to vector<8x8xf32>
    %68 = vector.extract_strided_slice %27 {offsets = [0, 80], sizes = [8, 8], strides = [1, 1]} : vector<8x96xf32> to vector<8x8xf32>
    %cst_30 = arith.constant dense<0.000000e+00> : vector<8x8xf32>
    %69 = tpu.matmul %66, %67, %cst_30 {dimension_numbers = #tpu.dot_dimension_numbers<[1], [1], [0], [0], [0, 0, 1, 0], [], []>} : vector<8x8xf32>, vector<8x8xf32>, vector<8x8xf32> -> vector<8x8xf32>
    %cst_31 = arith.constant dense<0xFF800000> : vector<8xf32>
    %70 = vector.multi_reduction <maximumf>, %69, %cst_31 [1] : vector<8x8xf32> to vector<8xf32>
    %71 = vector.shape_cast %70 : vector<8xf32> to vector<8x1xf32>
    %72 = vector.broadcast %71 : vector<8x1xf32> to vector<8x8xf32>
    %73 = arith.subf %69, %72 : vector<8x8xf32>
    %74 = math.exp %73 : vector<8x8xf32>
    %cst_32 = arith.constant dense<0.000000e+00> : vector<8xf32>
    %75 = vector.multi_reduction <add>, %74, %cst_32 [1] : vector<8x8xf32> to vector<8xf32>
    %76 = vector.shape_cast %75 : vector<8xf32> to vector<8x1xf32>
    %77 = tpu.reciprocal %76 : vector<8x1xf32> -> vector<8x1xf32>
    %78 = vector.broadcast %77 : vector<8x1xf32> to vector<8x8xf32>
    %79 = arith.mulf %74, %78 : vector<8x8xf32>
    %c0_33 = arith.constant 0 : index
    %c2 = arith.constant 2 : index
    %c0_34 = arith.constant 0 : index
    %c0_35 = arith.constant 0 : index
    %80 = vector.load %arg14[%c0_33, %c2, %c0_34, %c0_35] : memref<1x4x8x8xf32, #tpu.memory_space<vmem>>, vector<1x1x8x8xf32>
    %81 = vector.shape_cast %80 : vector<1x1x8x8xf32> to vector<8x8xf32>
    %82 = vector.shape_cast %79 : vector<8x8xf32> to vector<1x1x8x8xf32>
    tpu.vector_store %arg14[%c0_33, %c2, %c0_34, %c0_35], %82 {strides = array<i32>} : memref<1x4x8x8xf32, #tpu.memory_space<vmem>>, vector<1x1x8x8xf32>,
    %cst_36 = arith.constant dense<0.000000e+00> : vector<8x8xf32>
    %83 = tpu.matmul %79, %68, %cst_36 {dimension_numbers = #tpu.dot_dimension_numbers<[1], [0], [0], [1], [0, 0, 1, 1], [], []>} : vector<8x8xf32>, vector<8x8xf32>, vector<8x8xf32> -> vector<8x8xf32>
    %84 = vector.extract_strided_slice %27 {offsets = [0, 24], sizes = [8, 8], strides = [1, 1]} : vector<8x96xf32> to vector<8x8xf32>
    %85 = vector.extract_strided_slice %27 {offsets = [0, 56], sizes = [8, 8], strides = [1, 1]} : vector<8x96xf32> to vector<8x8xf32>
    %86 = vector.extract_strided_slice %27 {offsets = [0, 88], sizes = [8, 8], strides = [1, 1]} : vector<8x96xf32> to vector<8x8xf32>
    %cst_37 = arith.constant dense<0.000000e+00> : vector<8x8xf32>
    %87 = tpu.matmul %84, %85, %cst_37 {dimension_numbers = #tpu.dot_dimension_numbers<[1], [1], [0], [0], [0, 0, 1, 0], [], []>} : vector<8x8xf32>, vector<8x8xf32>, vector<8x8xf32> -> vector<8x8xf32>
    %cst_38 = arith.constant dense<0xFF800000> : vector<8xf32>
    %88 = vector.multi_reduction <maximumf>, %87, %cst_38 [1] : vector<8x8xf32> to vector<8xf32>
    %89 = vector.shape_cast %88 : vector<8xf32> to vector<8x1xf32>
    %90 = vector.broadcast %89 : vector<8x1xf32> to vector<8x8xf32>
    %91 = arith.subf %87, %90 : vector<8x8xf32>
    %92 = math.exp %91 : vector<8x8xf32>
    %cst_39 = arith.constant dense<0.000000e+00> : vector<8xf32>
    %93 = vector.multi_reduction <add>, %92, %cst_39 [1] : vector<8x8xf32> to vector<8xf32>
    %94 = vector.shape_cast %93 : vector<8xf32> to vector<8x1xf32>
    %95 = tpu.reciprocal %94 : vector<8x1xf32> -> vector<8x1xf32>
    %96 = vector.broadcast %95 : vector<8x1xf32> to vector<8x8xf32>
    %97 = arith.mulf %92, %96 : vector<8x8xf32>
    %c0_40 = arith.constant 0 : index
    %c3 = arith.constant 3 : index
    %c0_41 = arith.constant 0 : index
    %c0_42 = arith.constant 0 : index
    %98 = vector.load %arg14[%c0_40, %c3, %c0_41, %c0_42] : memref<1x4x8x8xf32, #tpu.memory_space<vmem>>, vector<1x1x8x8xf32>
    %99 = vector.shape_cast %98 : vector<1x1x8x8xf32> to vector<8x8xf32>
    %100 = vector.shape_cast %97 : vector<8x8xf32> to vector<1x1x8x8xf32>
    tpu.vector_store %arg14[%c0_40, %c3, %c0_41, %c0_42], %100 {strides = array<i32>} : memref<1x4x8x8xf32, #tpu.memory_space<vmem>>, vector<1x1x8x8xf32>,
    %cst_43 = arith.constant dense<0.000000e+00> : vector<8x8xf32>
    %101 = tpu.matmul %97, %86, %cst_43 {dimension_numbers = #tpu.dot_dimension_numbers<[1], [0], [0], [1], [0, 0, 1, 1], [], []>} : vector<8x8xf32>, vector<8x8xf32>, vector<8x8xf32> -> vector<8x8xf32>
    %102 = tpu.concatenate %83, %101 in 1 : vector<8x8xf32>, vector<8x8xf32> -> vector<8x16xf32>
    %c0_44 = arith.constant 0 : index
    %c16 = arith.constant 16 : index
    %103 = vector.load %arg15[%c0_44, %c16] : memref<8x32xf32, #tpu.memory_space<vmem>>, vector<8x16xf32>
    tpu.vector_store %arg15[%c0_44, %c16], %102 {strides = array<i32>} : memref<8x32xf32, #tpu.memory_space<vmem>>, vector<8x16xf32>,
    %c0_45 = arith.constant 0 : index
    %c0_46 = arith.constant 0 : index
    %104 = vector.load %arg15[%c0_45, %c0_46] : memref<8x32xf32, #tpu.memory_space<vmem>>, vector<8x32xf32>
    %c0_47 = arith.constant 0 : index
    %c0_48 = arith.constant 0 : index
    %105 = vector.load %arg5[%c0_47, %c0_48] : memref<32x32xf32, #tpu.memory_space<vmem>>, vector<32x32xf32>
    %cst_49 = arith.constant dense<0.000000e+00> : vector<8x32xf32>
    %106 = tpu.matmul %104, %105, %cst_49 {dimension_numbers = #tpu.dot_dimension_numbers<[1], [0], [0], [1], [0, 0, 1, 1], [], []>} : vector<8x32xf32>, vector<32x32xf32>, vector<8x32xf32> -> vector<8x32xf32>
    %c0_50 = arith.constant 0 : index
    %c0_51 = arith.constant 0 : index
    %107 = vector.load %arg6[%c0_50, %c0_51] : memref<1x32xf32, #tpu.memory_space<vmem>>, vector<1x32xf32>
    %108 = vector.broadcast %107 : vector<1x32xf32> to vector<8x32xf32>
    %109 = arith.addf %106, %108 : vector<8x32xf32>
    %110 = arith.addf %1, %109 : vector<8x32xf32>
    %c0_52 = arith.constant 0 : index
    %c0_53 = arith.constant 0 : index
    %111 = vector.load %arg7[%c0_52, %c0_53] : memref<1x32xf32, #tpu.memory_space<vmem>>, vector<1x32xf32>
    %c0_54 = arith.constant 0 : index
    %c0_55 = arith.constant 0 : index
    %112 = vector.load %arg8[%c0_54, %c0_55] : memref<1x32xf32, #tpu.memory_space<vmem>>, vector<1x32xf32>
    %cst_56 = arith.constant dense<0.000000e+00> : vector<8xf32>
    %113 = vector.multi_reduction <add>, %110, %cst_56 [1] : vector<8x32xf32> to vector<8xf32>
    %114 = vector.shape_cast %113 : vector<8xf32> to vector<8x1xf32>
    %cst_57 = arith.constant 3.200000e+01 : f32
    %115 = vector.broadcast %cst_57 : f32 to vector<8x1xf32>
    %116 = arith.divf %114, %115 : vector<8x1xf32>
    %117 = vector.broadcast %116 : vector<8x1xf32> to vector<8x32xf32>
    %118 = arith.subf %110, %117 : vector<8x32xf32>
    %119 = arith.mulf %118, %118 : vector<8x32xf32>
    %cst_58 = arith.constant dense<0.000000e+00> : vector<8xf32>
    %120 = vector.multi_reduction <add>, %119, %cst_58 [1] : vector<8x32xf32> to vector<8xf32>
    %121 = vector.shape_cast %120 : vector<8xf32> to vector<8x1xf32>
    %cst_59 = arith.constant 3.200000e+01 : f32
    %122 = vector.broadcast %cst_59 : f32 to vector<8x1xf32>
    %123 = arith.divf %121, %122 : vector<8x1xf32>
    %124 = vector.broadcast %116 : vector<8x1xf32> to vector<8x32xf32>
    %125 = arith.subf %110, %124 : vector<8x32xf32>
    %cst_60 = arith.constant 9.99999974E-6 : f32
    %126 = vector.broadcast %cst_60 : f32 to vector<8x1xf32>
    %127 = arith.addf %123, %126 : vector<8x1xf32>
    %128 = math.rsqrt %127 : vector<8x1xf32>
    %129 = vector.broadcast %128 : vector<8x1xf32> to vector<8x32xf32>
    %130 = arith.mulf %125, %129 : vector<8x32xf32>
    %131 = vector.broadcast %111 : vector<1x32xf32> to vector<8x32xf32>
    %132 = arith.mulf %130, %131 : vector<8x32xf32>
    %133 = vector.broadcast %112 : vector<1x32xf32> to vector<8x32xf32>
    %134 = arith.addf %132, %133 : vector<8x32xf32>
    %c0_61 = arith.constant 0 : index
    %c0_62 = arith.constant 0 : index
    %135 = vector.load %arg9[%c0_61, %c0_62] : memref<32x128xf32, #tpu.memory_space<vmem>>, vector<32x128xf32>
    %cst_63 = arith.constant dense<0.000000e+00> : vector<8x128xf32>
    %136 = tpu.matmul %134, %135, %cst_63 {dimension_numbers = #tpu.dot_dimension_numbers<[1], [0], [0], [1], [0, 0, 1, 1], [], []>} : vector<8x32xf32>, vector<32x128xf32>, vector<8x128xf32> -> vector<8x128xf32>
    %c0_64 = arith.constant 0 : index
    %c0_65 = arith.constant 0 : index
    %137 = vector.load %arg10[%c0_64, %c0_65] : memref<1x128xf32, #tpu.memory_space<vmem>>, vector<1x128xf32>
    %138 = vector.broadcast %137 : vector<1x128xf32> to vector<8x128xf32>
    %139 = arith.addf %136, %138 : vector<8x128xf32>
    %cst_66 = arith.constant 5.000000e-01 : f32
    %140 = vector.broadcast %cst_66 : f32 to vector<8x128xf32>
    %141 = arith.mulf %140, %139 : vector<8x128xf32>
    %cst_67 = arith.constant 0.707106769 : f32
    %142 = vector.broadcast %cst_67 : f32 to vector<8x128xf32>
    %143 = arith.mulf %139, %142 : vector<8x128xf32>
    %144 = math.erf %143 : vector<8x128xf32>
    %cst_68 = arith.constant 1.000000e+00 : f32
    %145 = vector.broadcast %cst_68 : f32 to vector<8x128xf32>
    %146 = arith.addf %145, %144 : vector<8x128xf32>
    %147 = arith.mulf %141, %146 : vector<8x128xf32>
    %c0_69 = arith.constant 0 : index
    %c0_70 = arith.constant 0 : index
    %148 = vector.load %arg11[%c0_69, %c0_70] : memref<128x32xf32, #tpu.memory_space<vmem>>, vector<128x32xf32>
    %cst_71 = arith.constant dense<0.000000e+00> : vector<8x32xf32>
    %149 = tpu.matmul %147, %148, %cst_71 {dimension_numbers = #tpu.dot_dimension_numbers<[1], [0], [0], [1], [0, 0, 1, 1], [], []>} : vector<8x128xf32>, vector<128x32xf32>, vector<8x32xf32> -> vector<8x32xf32>
    %c0_72 = arith.constant 0 : index
    %c0_73 = arith.constant 0 : index
    %150 = vector.load %arg12[%c0_72, %c0_73] : memref<1x32xf32, #tpu.memory_space<vmem>>, vector<1x32xf32>
    %151 = vector.broadcast %150 : vector<1x32xf32> to vector<8x32xf32>
    %152 = arith.addf %149, %151 : vector<8x32xf32>
    %153 = arith.addf %110, %152 : vector<8x32xf32>
    %c0_74 = arith.constant 0 : index
    %c0_75 = arith.constant 0 : index
    %c0_76 = arith.constant 0 : index
    %154 = vector.load %arg13[%c0_74, %c0_75, %c0_76] : memref<1x8x32xf32, #tpu.memory_space<vmem>>, vector<1x8x32xf32>
    %155 = vector.shape_cast %154 : vector<1x8x32xf32> to vector<8x32xf32>
    %156 = vector.shape_cast %153 : vector<8x32xf32> to vector<1x8x32xf32>
    tpu.vector_store %arg13[%c0_74, %c0_75, %c0_76], %156 {strides = array<i32>} : memref<1x8x32xf32, #tpu.memory_space<vmem>>, vector<1x8x32xf32>,
    return
  }
  func.func @transform_0(%arg0: i32) -> (i32, i32, i32) {
    %c0_i32 = arith.constant 0 : i32
    %c0_i32_0 = arith.constant 0 : i32
    %c0_i32_1 = arith.constant 0 : i32
    return %arg0, %c0_i32, %c0_i32_0 : i32, i32, i32
  }
  func.func @transform_1(%arg0: i32) -> (i32, i32) {
    %c0_i32 = arith.constant 0 : i32
    %c0_i32_0 = arith.constant 0 : i32
    %c0_i32_1 = arith.constant 0 : i32
    return %c0_i32, %c0_i32_0 : i32, i32
  }
  func.func @transform_2(%arg0: i32) -> (i32, i32) {
    %c0_i32 = arith.constant 0 : i32
    %c0_i32_0 = arith.constant 0 : i32
    %c0_i32_1 = arith.constant 0 : i32
    return %c0_i32, %c0_i32_0 : i32, i32
  }
  func.func @transform_3(%arg0: i32) -> (i32, i32) {
    %c0_i32 = arith.constant 0 : i32
    %c0_i32_0 = arith.constant 0 : i32
    %c0_i32_1 = arith.constant 0 : i32
    return %c0_i32, %c0_i32_0 : i32, i32
  }
  func.func @transform_4(%arg0: i32) -> (i32, i32) {
    %c0_i32 = arith.constant 0 : i32
    %c0_i32_0 = arith.constant 0 : i32
    %c0_i32_1 = arith.constant 0 : i32
    return %c0_i32, %c0_i32_0 : i32, i32
  }
  func.func @transform_5(%arg0: i32) -> (i32, i32) {
    %c0_i32 = arith.constant 0 : i32
    %c0_i32_0 = arith.constant 0 : i32
    %c0_i32_1 = arith.constant 0 : i32
    return %c0_i32, %c0_i32_0 : i32, i32
  }
  func.func @transform_6(%arg0: i32) -> (i32, i32) {
    %c0_i32 = arith.constant 0 : i32
    %c0_i32_0 = arith.constant 0 : i32
    %c0_i32_1 = arith.constant 0 : i32
    return %c0_i32, %c0_i32_0 : i32, i32
  }
  func.func @transform_7(%arg0: i32) -> (i32, i32) {
    %c0_i32 = arith.constant 0 : i32
    %c0_i32_0 = arith.constant 0 : i32
    %c0_i32_1 = arith.constant 0 : i32
    return %c0_i32, %c0_i32_0 : i32, i32
  }
  func.func @transform_8(%arg0: i32) -> (i32, i32) {
    %c0_i32 = arith.constant 0 : i32
    %c0_i32_0 = arith.constant 0 : i32
    %c0_i32_1 = arith.constant 0 : i32
    return %c0_i32, %c0_i32_0 : i32, i32
  }
  func.func @transform_9(%arg0: i32) -> (i32, i32) {
    %c0_i32 = arith.constant 0 : i32
    %c0_i32_0 = arith.constant 0 : i32
    %c0_i32_1 = arith.constant 0 : i32
    return %c0_i32, %c0_i32_0 : i32, i32
  }
  func.func @transform_10(%arg0: i32) -> (i32, i32) {
    %c0_i32 = arith.constant 0 : i32
    %c0_i32_0 = arith.constant 0 : i32
    %c0_i32_1 = arith.constant 0 : i32
    return %c0_i32, %c0_i32_0 : i32, i32
  }
  func.func @transform_11(%arg0: i32) -> (i32, i32) {
    %c0_i32 = arith.constant 0 : i32
    %c0_i32_0 = arith.constant 0 : i32
    %c0_i32_1 = arith.constant 0 : i32
    return %c0_i32, %c0_i32_0 : i32, i32
  }
  func.func @transform_12(%arg0: i32) -> (i32, i32, i32) {
    %c0_i32 = arith.constant 0 : i32
    %c0_i32_0 = arith.constant 0 : i32
    %c0_i32_1 = arith.constant 0 : i32
    return %arg0, %c0_i32, %c0_i32_0 : i32, i32, i32
  }
  func.func @transform_13(%arg0: i32) -> (i32, i32, i32, i32) {
    %c0_i32 = arith.constant 0 : i32
    %c0_i32_0 = arith.constant 0 : i32
    %c0_i32_1 = arith.constant 0 : i32
    %c0_i32_2 = arith.constant 0 : i32
    return %arg0, %c0_i32, %c0_i32_0, %c0_i32_1 : i32, i32, i32, i32
  }
}

</mosaic_0001>

<bundles_post_ra>
// kernel: tpu_custom_call.1
= control target key start
LH: loop header
LB: loop body
LE: loop exit
PB: predicated region body
PF: predicated region fallthrough
CT: control target
= control target key end

     0   :  { %s1765_s0 = inlined_call_operand.vmem [shape: f32[2,8,32], index: 0, kind: input, shape index: {}]   ;;  %s1766_s1 = inlined_call_operand.vmem [shape: f32[1,32], index: 1, kind: input, shape index: {}]   ;;  %s1767_s2 = inlined_call_operand.vmem [shape: f32[1,32], index: 2, kind: input, shape index: {}]   ;;  %s1768_s3 = inlined_call_operand.vmem [shape: f32[32,96], index: 3, kind: input, shape index: {}]   ;;  %s1769_s4 = inlined_call_operand.vmem [shape: f32[32,32], index: 4, kind: input, shape index: {}]   ;;  %s1770_s5 = inlined_call_operand.vmem [shape: f32[1,32], index: 5, kind: input, shape index: {}]   ;;  %s1771_s6 = inlined_call_operand.vmem [shape: f32[1,32], index: 6, kind: input, shape index: {}]   ;;  %s1772_s7 = inlined_call_operand.vmem [shape: f32[1,32], index: 7, kind: input, shape index: {}]   ;;  %s1773_s8 = inlined_call_operand.vmem [shape: f32[32,128], index: 8, kind: input, shape index: {}]   ;;  %s1774_s9 = inlined_call_operand.vmem [shape: f32[1,128], index: 9, kind: input, shape index: {}]   ;;  %s1775_s10 = inlined_call_operand.vmem [shape: f32[128,32], index: 10, kind: input, shape index: {}]   ;;  %s1776_s11 = inlined_call_operand.vmem [shape: f32[1,32], index: 11, kind: input, shape index: {}]   ;;  %s1777_s12 = inlined_call_operand.hbm [shape: f32[2,8,32], index: 12, kind: output, shape index: {0}]   ;;  %s1778_s13 = inlined_call_operand.hbm [shape: f32[2,4,8,8], index: 13, kind: output, shape index: {1}]  }
   0x1   :  { %1780 = sst [smem:[#allocation9_spill]] %s1765_s0 }
   0x2   :  { %1781 = sst [smem:[#allocation10_spill]] %s1766_s1 }
   0x3   :  { %1782 = sst [smem:[#allocation11_spill]] %s1767_s2 }
   0x4   :  { %1783 = sst [smem:[#allocation12_spill]] %s1768_s3 }
   0x5   :  { %1784 = sst [smem:[#allocation13_spill]] %s1769_s4 }
   0x6   :  { %1785 = sst [smem:[#allocation14_spill]] %s1770_s5 }
   0x7   :  { %1786 = sst [smem:[#allocation15_spill]] %s1771_s6 }
   0x8   :  { %1787 = sst [smem:[#allocation16_spill]] %s1772_s7 }
   0x9   :  { %19 = vsyncpa [#allocation4], 0 }
   0xa   :  { %21 = vsyncpa [#allocation4 + $0x1], 0 }
   0xb   :  { %22 = vsyncpa [#allocation6], 0 }
   0xc   :  { %24 = vsyncpa [#allocation6 + $0x1], 0  ;;  %s1469_s25 = smov 0   ;;  %s1471_s26 = smov 0  }
   0xd   :  { %s1473_s27 = smov 0   ;;  %s1475_s28 = smov 0  }
   0xe LB: > { %s1490_s29 = sadd.s32 4294967295, %s1382_s28   ;;  %s1164_s30 = sadd.s32 4294967294, %s1382_s28   ;;  %s1382_s28 = sphi %s1475_s28, %s1802_s28   ;;  %s1378_s27 = sphi %s1473_s27, %s1801_s27   ;;  %s1374_s26 = sphi %s1471_s26, %s1800_s26   ;;  %s1370_s25 = sphi %s1469_s25, %s1799_s25  }
   0xf   : > { %s1494_s14 = sadd.s32 1, %s1382_s28   ;;  %s294_s15 = sadd.s32 1, %s1378_s27 }
  0x10   : > { %s291_s16 = ssub.s32 %s1382_s28, %s1494_s14  ;;  %p304_p0 = scmp.ne.s32.totalorder %s1378_s27, %s1374_s26 }
  0x11   : > { %p292_p1 = scmp.eq.s32.totalorder %s291_s16, 0  ;;  %p305_p2 = scmp.eq.s32.totalorder %s1490_s29, 1 }
  0x12   : > { %p310_p3 = scmp.ne.s32.totalorder %s1374_s26, %s1370_s25  ;;  %p311_p4 = scmp.eq.s32.totalorder %s1164_s30, 1 }
  0x13   : > { %s1505_s17 = scalar_select %p292_p1, %s1378_s27, %s294_s15  }
  0x14   : > { %p1507_p5 = por %p305_p2, %p304_p0  ;;  %p1511_p6 = por %p311_p4, %p310_p3 }
  0x15   : > { %p1167_p7 = scmp.ge.s32.totalorder %s1382_s28, 1  ;;  %p395_p8 = scmp.lt.s32.totalorder %s1382_s28, 3 }
  0x17   : > { %p396_p9 = pnand %p1167_p7, %p395_p8 }
  0x18   : > { %p443_p10 = scmp.lt.s32.totalorder (!%p396_p9), %s1490_s29, 1  ;;  %s1790_s0 = sld [smem:[#allocation9_spill]] (!%p396_p9) }
  0x19   : > { %399 = sbr.rel (%p396_p9) target bundleno = 2053 (0x805), region = 68  ;;  %s1791_s3 = sld [smem:[#allocation12_spill]] (!%p396_p9) }
  0x1a   : > { %s1792_s1 = sld [smem:[#allocation10_spill]] (!%p396_p9)  ;;  %s1386_s22 = smov (!%p396_p9), 120  }
  0x1b   : > { %s1793_s2 = sld [smem:[#allocation11_spill]] (!%p396_p9)  ;;  %s1387_s23 = smov (!%p396_p9), 96  }
  0x1c   : > { %s1389_s30 = smov (!%p396_p9), 88   ;;  %s1390_s15 = smov (!%p396_p9), 104  }
  0x1d   : > { %s1391_s16 = smov (!%p396_p9), 72   ;;  %s1794_s4 = sld [smem:[#allocation13_spill]] (!%p396_p9) }
  0x1e   : > { %s444_s20 = scalar_select %p443_p10, %s1490_s29, 1  ;;  %vm450_vm0 = vcmask 261120   ;;  %v1384_v2 = vmov 32.0   ;;  %vm518_vm5 = vcmask 64512  }
  0x1f   : > { %1264 = vrcp.f32 %v1384_v2  ;;  %v491_v14 = vld [vmem:[%s1791_s3 + $0x18] sm:$0xff]  ;;  %v490_v15 = vld [vmem:[%s1791_s3 + $0x10] sm:$0xff]  ;;  %v489_v16 = vld [vmem:[%s1791_s3 + $0x8] sm:$0xff]  ;;  %s1795_s5 = sld [smem:[#allocation14_spill]] }
  0x20   : > { %s1170_s21 = sshll.u32 %s444_s20, 3  ;;  %507 = vmatpush.msra.mxu2 %v491_v14  ;;  %v488_v17 = vld [vmem:[%s1791_s3] sm:$0xff]  ;;  %s1392_s20 = smov 64  }
  0x21   : > { %s446_s24 = scalar_lea.vmem %s1790_s0, %s1170_s21  ;;  %v1257_v27 = vld [vmem:[%s1792_s1] ss:$0 sm:$0xff]  ;;  %s1385_s21 = smov 112  }
  0x22   : > { %v1522_v0 = vld [vmem:[%s446_s24] sm:$0xff]  ;;  %508 = vmatpush.msra.mxu2 %v490_v15  ;;  %s1388_s24 = smov 80   ;;  %s1796_s6 = sld [smem:[#allocation15_spill]] }
  0x23   : > { %v451_v1 = vsel %vm450_vm0, %v1522_v0, 0.0  ;;  %v1258_v30 = vld [vmem:[%s1793_s2] ss:$0 sm:$0xff]  ;;  %s1797_s7 = sld [smem:[#allocation16_spill]] }
  0x24   : > { %452 = vadd.xlane.f32.xlu0 %v451_v1  ;;  %509 = vmatpush.msra.mxu2 %v489_v16 }
  0x25   : > { %v1265_v3 = vpop.eup %1264 }
  0x26   : > { %v455_v4 = vmul.f32 32.0, %v1265_v3  ;;  %vm459_vm1 = vweird.f32 %v1265_v3  ;;  %510 = vmatpush.msra.mxu2 %v488_v17 }
  0x28   : > { %v456_v5 = vsub.f32 1.0, %v455_v4 }
  0x2a   : > { %v457_v6 = vmul.f32 %v1265_v3, %v456_v5 }
  0x2c   : > { %v458_v7 = vadd.f32 %v1265_v3, %v457_v6 }
  0x2e   : > { %v1526_v8 = vsel %vm459_vm1, %v1265_v3, %v458_v7 }
  0x97   : > { %v453_v9 = vpop.xlane.xlu0 %452 }
  0x98   : > { %v461_v10 = vmul.f32 %v1526_v8, %v453_v9 }
  0x9a   : > { %v462_v11 = vsub.f32 %v1522_v0, %v461_v10 }
  0x9c   : > { %v463_v12 = vmul.f32 %v462_v11, %v462_v11 }
  0x9e   : > { %v464_v13 = vsel %vm450_vm0, %v463_v12, 0.0 }
  0x9f   : > { %465 = vadd.xlane.f32.xlu0 %v464_v13 }
 0x112   : > { %v466_v18 = vpop.xlane.xlu0 %465 }
 0x113   : > { %v467_v19 = vmul.f32 %v466_v18, %v1526_v8 }
 0x115   : > { %v468_v20 = vadd.f32 1e-05, %v467_v19 }
 0x117   : > { %1266 = vrsqrt.f32 %v468_v20  ;;  %vm475_vm3 = vweird.f32 %v468_v20 }
 0x11d   : > { %v1267_v21 = vpop.eup %1266 }
 0x11e   : > { %v470_v22 = vmul.f32 %v1267_v21, %v468_v20  ;;  %vm476_vm2 = vweird.f32 %v1267_v21 }
 0x11f   : > { %vm477_vm4 = vmor %vm475_vm3, %vm476_vm2 }
 0x120   : > { %v471_v23 = vmul.f32 %v1267_v21, %v470_v22 }
 0x122   : > { %v472_v24 = vmul.f32 0.5, %v471_v23 }
 0x124   : > { %v473_v25 = vsub.f32 1.5, %v472_v24 }
 0x126   : > { %v474_v26 = vmul.f32 %v1267_v21, %v473_v25 }
 0x128   : > { %v478_v28 = vsel %vm477_vm4, %v1267_v21, %v474_v26 }
 0x129   : > { %v479_v29 = vmul.f32 %v478_v28, %v462_v11 }
 0x12b   : > { %v483_v31 = vmul.f32 %v1257_v27, %v479_v29 }
 0x12d   : > { %v487_v32 = vadd.f32 %v1258_v30, %v483_v31 }
 0x12f   : > { %1171 = vmatmul.msk.f32.vlgmr.msra.gmra.mxu2 %vm450_vm0, %v487_v32 }
 0x1b2   : > { %v1551_v33 = vpop.f32.mrf.mxu2 }
 0x1b3   : > { %681 = vrot.lane.b32.xlu0 %v1551_v33, %s1385_s21  ;;  %594 = vrot.lane.b32.xlu2 %v1551_v33, %s1386_s22  ;;  %s1393_s21 = smov 56   ;;  %s1394_s22 = smov 40  }
 0x1b4   : > { %516 = vrot.lane.b32.xlu1 %v1551_v33, %s1387_s23  ;;  %s1395_s23 = smov 48  }
 0x1bb   : > { %683 = vrot.lane.b32.xlu2 %v1551_v33, %s1388_s24  ;;  %s1591_s24 = sand.u32 1, %s1374_s26  }
 0x1bc   : > { %596 = vrot.lane.b32.xlu1 %v1551_v33, %s1389_s30  ;;  %s1169_s30 = sshll.u32 %s1591_s24, 5 }
 0x1c3   : > { %761 = vrot.lane.b32.xlu2 %v1551_v33, %s1390_s15  ;;  %s1595_s15 = scalar_lea.vmem [#allocation5], %s1169_s30 }
 0x1c4   : > { %763 = vrot.lane.b32.xlu1 %v1551_v33, %s1391_s16  ;;  %s1779_s16 = smov 8  }
 0x20d   : > { %v595_v34 = vpop.permute.xlu2 %594 }
 0x215   : > { %v684_v36 = vpop.permute.xlu2 %683 }
 0x21d   : > { %v762_v40 = vpop.permute.xlu2 %761 }
 0x225   : > { %v682_v38 = vpop.permute.xlu0 %681 }
 0x226   : > { %v517_v35 = vpop.permute.xlu1 %516 }
 0x227   : > { %1172 = vmatpush.xpose.msk.msra.mxu1 %vm518_vm5, %v517_v35 }
 0x22a   : > { %1173 = vmatmul.msk.f32.vlgmr.msra.gmra.mxu1 %vm518_vm5, %v1551_v33 }
 0x22b   : > { %1179 = vmatpush.xpose.msk.msrb.mxu1 %vm518_vm5, %v684_v36 }
 0x22e   : > { %v597_v37 = vpop.permute.xlu1 %596 }
 0x22f   : > { %1175 = vmatpush.xpose.msk.msra.mxu3 %vm518_vm5, %v597_v37 }
 0x232   : > { %1176 = vmatmul.msk.f32.vlgmr.msra.gmra.mxu3 %vm518_vm5, %v595_v34  ;;  %1180 = vmatmul.msk.f32.vlgmr.msrb.gmra.mxu1 %vm518_vm5, %v682_v38 }
 0x236   : > { %v764_v39 = vpop.permute.xlu1 %763 }
 0x237   : > { %1183 = vmatpush.xpose.msk.msra.mxu1 %vm518_vm5, %v764_v39 }
 0x23a   : > { %1184 = vmatmul.msk.f32.vlgmr.msra.gmra.mxu1 %vm518_vm5, %v762_v40 }
 0x2a7   : > { %v540_v41 = vpop.f32.mrf.mxu1 }
 0x2a8   : > { %v543_v42 = vsel %vm518_vm5, %v540_v41, -inf }
 0x2a9   : > { %544 = vmax.xlane.f32.xlu1 %v543_v42 }
 0x2af   : > { %v706_v43 = vpop.f32.mrf.mxu1 }
 0x2b0   : > { %v709_v44 = vsel %vm518_vm5, %v706_v43, -inf }
 0x2b1   : > { %710 = vmax.xlane.f32.xlu1 %v709_v44 }
 0x2b5   : > { %v619_v45 = vpop.f32.mrf.mxu3 }
 0x2b6   : > { %v622_v46 = vsel %vm518_vm5, %v619_v45, -inf }
 0x2b7   : > { %623 = vmax.xlane.f32.xlu2 %v622_v46  ;;  %v786_v47 = vpop.f32.mrf.mxu1 }
 0x2b8   : > { %v789_v48 = vsel %vm518_vm5, %v786_v47, -inf }
 0x2b9   : > { %790 = vmax.xlane.f32.xlu0 %v789_v48 }
 0x2cd   : > { %568 = vrot.lane.b32.xlu0 %v1551_v33, %s1392_s20  ;;  %s1397_s20 = smov 16  }
 0x31c   : > { %v545_v49 = vpop.xlane.xlu1 %544 }
 0x31d   : > { %v546_v50 = vsub.f32 %v540_v41, %v545_v49 }
 0x31f   : > { %v547_v51 = vmul.f32 1.442695, %v546_v50 }
 0x321   : > { %1268 = vpow2.f32 %v547_v51 }
 0x324   : > { %v711_v52 = vpop.xlane.xlu1 %710 }
 0x325   : > { %v712_v53 = vsub.f32 %v706_v43, %v711_v52 }
 0x327   : > { %v1269_v54 = vpop.eup %1268  ;;  %v713_v55 = vmul.f32 1.442695, %v712_v53 }
 0x328   : > { %v549_v56 = vsel %vm518_vm5, %v1269_v54, 0.0 }
 0x329   : > { %1270 = vpow2.f32 %v713_v55  ;;  %550 = vadd.xlane.f32.xlu2 %v549_v56 }
 0x32a   : > { %v624_v57 = vpop.xlane.xlu2 %623 }
 0x32b   : > { %v625_v58 = vsub.f32 %v619_v45, %v624_v57 }
 0x32c   : > { %v791_v59 = vpop.xlane.xlu0 %790 }
 0x32d   : > { %v626_v60 = vmul.f32 1.442695, %v625_v58  ;;  %v792_v61 = vsub.f32 %v786_v47, %v791_v59 }
 0x32f   : > { %v1575_v62 = vpop.eup %1270  ;;  %1272 = vpow2.f32 %v626_v60  ;;  %v793_v63 = vmul.f32 1.442695, %v792_v61 }
 0x330   : > { %v715_v1 = vsel %vm518_vm5, %v1575_v62, 0.0 }
 0x331   : > { %1274 = vpow2.f32 %v793_v63  ;;  %716 = vadd.xlane.f32.xlu0 %v715_v1 }
 0x335   : > { %v1579_v2 = vpop.eup %1272 }
 0x336   : > { %v628_v3 = vsel %vm518_vm5, %v1579_v2, 0.0 }
 0x337   : > { %v1583_v4 = vpop.eup %1274  ;;  %629 = vadd.xlane.f32.xlu2 %v628_v3 }
 0x338   : > { %v795_v5 = vsel %vm518_vm5, %v1583_v4, 0.0 }
 0x339   : > { %796 = vadd.xlane.f32.xlu1 %v795_v5  ;;  %v855_v5 = vld [vmem:[%s1794_s4 + $0x10] sm:$0xff] }
 0x33f   : > { %v569_v6 = vpop.permute.xlu0 %568 }
 0x340   : > { %589 = vmatpush.msrb.mxu2 %v569_v6  ;;  %v854_v6 = vld [vmem:[%s1794_s4 + $0x8] sm:$0xff] }
 0x34f   : > { %648 = vrot.lane.b32.xlu2 %v1551_v33, %s1393_s21  ;;  %s1197_s21 = sshll.u32 %s1490_s29, 5 }
 0x350   : > { %s1065_s1 = scalar_lea.hbm %s1778_s13, %s1197_s21 }
 0x351   : > { %s1068_s2 = sshll.u32 %s1065_s1, 4  ;;  %s1069_s2 = int_to_ptr.hbm [resolvable:$true] %s1068_s2 }
 0x352   : > { %815 = vrot.lane.b32.xlu1 %v1551_v33, %s1394_s22  ;;  %s1302_s22 = sshra.s32 %s1069_s2, 4  ;;  %s1303_s22 = int_to_ptr.hbm [resolvable:$true] %s1302_s22 }
 0x353   : > { %p1309_p0 = scmp.lt.s32.totalorder %s1303_s22, %s1778_s13 }
 0x357   : > { %735 = vrot.lane.b32.xlu2 %v1551_v33, %s1395_s23  ;;  %s1304_s23 = scalar_lea.hbm %s1303_s22, 32 }
 0x358   : > { %p1305_p11 = scmp.ne.s32.totalorder %s1303_s22, %s1304_s23 }
 0x35a   : > { %p1306_p12 = pnand %p1305_p11, %p1507_p5 }
 0x35c   : > { %p1307_p13 = pneg %p1306_p12 }
 0x39c   : > { %v551_v7 = vpop.xlane.xlu2 %550 }
 0x39d   : > { %1276 = vrcp.f32 %v551_v7  ;;  %v563_v14 = vand.u32 2147483648, %v551_v7  ;;  %v561_v15 = vand.u32 2147483647, %v551_v7  ;;  %vm557_vm7 = vweird.f32 %v551_v7 }
 0x39f   : > { %v564_v19 = vor.u32 1.1754944e-38, %v563_v14  ;;  %vm562_vm9 = vcmp.eq.f32.partialorder %v561_v15, 8.507059e+37 }
 0x3a3   : > { %v1277_v9 = vpop.eup %1276 }
 0x3a4   : > { %v553_v10 = vmul.f32 %v1277_v9, %v551_v7  ;;  %v717_v11 = vpop.xlane.xlu0 %716  ;;  %vm558_vm6 = vweird.f32 %v1277_v9  ;;  %v853_v7 = vld [vmem:[%s1794_s4] sm:$0xff] }
 0x3a5   : > { %1278 = vrcp.f32 %v717_v11  ;;  %vm559_vm8 = vmor %vm557_vm7, %vm558_vm6  ;;  %v729_v25 = vand.u32 2147483648, %v717_v11  ;;  %v727_v28 = vand.u32 2147483647, %v717_v11  ;;  %vm723_vm11 = vweird.f32 %v717_v11 }
 0x3a6   : > { %v554_v12 = vsub.f32 1.0, %v553_v10 }
 0x3a7   : > { %v730_v34 = vor.u32 1.1754944e-38, %v729_v25  ;;  %vm728_vm13 = vcmp.eq.f32.partialorder %v727_v28, 8.507059e+37 }
 0x3a8   : > { %v555_v13 = vmul.f32 %v1277_v9, %v554_v12 }
 0x3aa   : > { %v556_v16 = vadd.f32 %v1277_v9, %v555_v13  ;;  %v630_v17 = vpop.xlane.xlu2 %629 }
 0x3ab   : > { %v1279_v18 = vpop.eup %1278  ;;  %1280 = vrcp.f32 %v630_v17  ;;  %v640_v38 = vand.u32 2147483647, %v630_v17  ;;  %v642_v39 = vand.u32 2147483648, %v630_v17  ;;  %vm636_vm15 = vweird.f32 %v630_v17 }
 0x3ac   : > { %v719_v20 = vmul.f32 %v1279_v18, %v717_v11  ;;  %v797_v21 = vpop.xlane.xlu1 %796  ;;  %v560_v22 = vsel %vm559_vm8, %v1277_v9, %v556_v16  ;;  %vm724_vm10 = vweird.f32 %v1279_v18  ;;  %vm679_vm8 = vcmask 130048   ;;  %v1259_v11 = vld [vmem:[%s1795_s5] ss:$0 sm:$0xff] }
 0x3ad   : > { %1282 = vrcp.f32 %v797_v21  ;;  %v565_v24 = vsel %vm562_vm9, %v564_v19, %v560_v22  ;;  %vm725_vm12 = vmor %vm723_vm11, %vm724_vm10  ;;  %v809_v44 = vand.u32 2147483648, %v797_v21  ;;  %v807_v47 = vand.u32 2147483647, %v797_v21  ;;  %v918_v22 = vld [vmem:[%s1773_s8 + $0x8] sm:$0xff] }
 0x3ae   : > { %v720_v23 = vsub.f32 1.0, %v719_v20  ;;  %v566_v26 = vmul.f32 %v1269_v54, %v565_v24  ;;  %v643_v48 = vor.u32 1.1754944e-38, %v642_v39  ;;  %vm641_vm3 = vcmp.eq.f32.partialorder %v640_v38, 8.507059e+37  ;;  %v1007_v38 = vld [vmem:[%s1775_s10 + $0x78] sm:$0xff]  ;;  %v1006_v39 = vld [vmem:[%s1775_s10 + $0x70] sm:$0xff] }
 0x3af   : > { %vm803_vm4 = vweird.f32 %v797_v21  ;;  %v810_v53 = vor.u32 1.1754944e-38, %v809_v44  ;;  %vm808_vm7 = vcmp.eq.f32.partialorder %v807_v47, 8.507059e+37  ;;  %1012 = vmatpush.msra.mxu0 %v1007_v38  ;;  %v1002_v44 = vld [vmem:[%s1775_s10 + $0x50] sm:$0xff]  ;;  %v1001_v47 = vld [vmem:[%s1775_s10 + $0x48] sm:$0xff] }
 0x3b0   : > { %v721_v27 = vmul.f32 %v1279_v18, %v720_v23  ;;  %1174 = vmatmul.msk.f32.vlgmr.msrb.gmra.mxu2 %vm518_vm5, %v566_v26  ;;  %567 = vst.msk [vmem:[%s1595_s15] sm:$0xff] %vm518_vm5, %v566_v26  ;;  %v917_v23 = vld [vmem:[%s1773_s8] sm:$0xff] }
 0x3b1   : > { %v1281_v29 = vpop.eup %1280  ;;  %1013 = vmatpush.msra.mxu0 %v1006_v39 }
 0x3b2   : > { %v722_v30 = vadd.f32 %v1279_v18, %v721_v27  ;;  %v632_v31 = vmul.f32 %v1281_v29, %v630_v17  ;;  %v649_v32 = vpop.permute.xlu2 %648  ;;  %vm637_vm14 = vweird.f32 %v1281_v29 }
 0x3b3   : > { %v1283_v33 = vpop.eup %1282  ;;  %669 = vmatpush.msra.mxu2 %v649_v32  ;;  %vm638_vm2 = vmor %vm636_vm15, %vm637_vm14 }
 0x3b4   : > { %v726_v35 = vsel %vm725_vm12, %v1279_v18, %v722_v30  ;;  %v633_v36 = vsub.f32 1.0, %v632_v31  ;;  %v799_v37 = vmul.f32 %v1283_v33, %v797_v21  ;;  %vm804_vm1 = vweird.f32 %v1283_v33  ;;  %v920_v21 = vld [vmem:[%s1773_s8 + $0x18] sm:$0xff] }
 0x3b5   : > { %v731_v40 = vsel %vm728_vm13, %v730_v34, %v726_v35  ;;  %vm805_vm6 = vmor %vm803_vm4, %vm804_vm1 }
 0x3b6   : > { %v634_v41 = vmul.f32 %v1281_v29, %v633_v36  ;;  %v800_v42 = vsub.f32 1.0, %v799_v37  ;;  %v732_v43 = vmul.f32 %v1575_v62, %v731_v40  ;;  %v1005_v40 = vld [vmem:[%s1775_s10 + $0x68] sm:$0xff] }
 0x3b7   : > { %1014 = vmatpush.msra.mxu0 %v1005_v40 }
 0x3b8   : > { %v635_v45 = vadd.f32 %v1281_v29, %v634_v41  ;;  %v801_v46 = vmul.f32 %v1283_v33, %v800_v42  ;;  %1181 = vst.msk [vmem:[%s1595_s15 + $0x10] sm:$0xff] %vm518_vm5, %v732_v43  ;;  %v1262_v41 = vld [vmem:[%s1774_s9] ss:$0 sm:$0xff] }
 0x3b9   : > { %v1004_v42 = vld [vmem:[%s1775_s10 + $0x60] sm:$0xff] }
 0x3ba   : > { %v639_v49 = vsel %vm638_vm2, %v1281_v29, %v635_v45  ;;  %v802_v50 = vadd.f32 %v1283_v33, %v801_v46  ;;  %v736_v51 = vpop.permute.xlu2 %735  ;;  %1015 = vmatpush.msra.mxu0 %v1004_v42 }
 0x3bb   : > { %v644_v52 = vsel %vm641_vm3, %v643_v48, %v639_v49  ;;  %756 = vmatpush.msrb.mxu3 %v736_v51  ;;  %v1000_v49 = vld [vmem:[%s1775_s10 + $0x40] sm:$0xff]  ;;  %v999_v51 = vld [vmem:[%s1775_s10 + $0x38] sm:$0xff] }
 0x3bc   : > { %v806_v54 = vsel %vm805_vm6, %v1283_v33, %v802_v50  ;;  %1182 = vmatmul.msk.f32.vlgmr.msrb.gmra.mxu3 %vm518_vm5, %v732_v43  ;;  %v645_v55 = vmul.f32 %v1579_v2, %v644_v52  ;;  %v1260_v33 = vld [vmem:[%s1796_s6] ss:$0 sm:$0xff]  ;;  %v1003_v43 = vld [vmem:[%s1775_s10 + $0x58] sm:$0xff] }
 0x3bd   : > { %v811_v56 = vsel %vm808_vm7, %v810_v53, %v806_v54  ;;  %940 = vmatpush.msra.mxu3 %v920_v21  ;;  %1016 = vmatpush.msra.mxu0 %v1003_v43  ;;  %v998_v53 = vld [vmem:[%s1775_s10 + $0x30] sm:$0xff] }
 0x3be   : > { %1178 = vmatmul.msk.f32.vlgmr.msra.gmra.mxu2 %vm518_vm5, %v645_v55  ;;  %v812_v57 = vmul.f32 %v1583_v4, %v811_v56  ;;  %1177 = vst.msk [vmem:[%s1595_s15 + $0x8] sm:$0xff] %vm518_vm5, %v645_v55  ;;  %v856_v4 = vld [vmem:[%s1794_s4 + $0x18] sm:$0xff]  ;;  %v997_v55 = vld [vmem:[%s1775_s10 + $0x28] sm:$0xff] }
 0x3bf   : > { %876 = vmatpush.msrb.mxu1 %v856_v4  ;;  %1017 = vmatpush.msra.mxu0 %v1002_v44 }
 0x3c0   : > { %1185 = vst.msk [vmem:[%s1595_s15 + $0x18] sm:$0xff] %vm518_vm5, %v812_v57 }
 0x3c1   : > { %877 = vmatpush.msrb.mxu1 %v855_v5  ;;  %1018 = vmatpush.msra.mxu0 %v1001_v47  ;;  %v992_v5 = vld [vmem:[%s1775_s10] sm:$0xff] }
 0x3c3   : > { %878 = vmatpush.msrb.mxu1 %v854_v6  ;;  %1019 = vmatpush.msra.mxu0 %v1000_v49 }
 0x3c4   : > { %v816_v58 = vpop.permute.xlu1 %815 }
 0x3c5   : > { %836 = vmatpush.msrb.mxu2 %v816_v58  ;;  %879 = vmatpush.msrb.mxu1 %v853_v7  ;;  %v996_v58 = vld [vmem:[%s1775_s10 + $0x20] sm:$0xff] }
 0x3c6   : > { %1186 = vmatmul.msk.f32.vlgmr.msrb.gmra.mxu2 %vm518_vm5, %v812_v57  ;;  %1020 = vmatpush.msra.mxu0 %v999_v51 }
 0x3c8   : > { %1021 = vmatpush.msra.mxu0 %v998_v53 }
 0x3ca   : > { %1022 = vmatpush.msra.mxu0 %v997_v55 }
 0x3cc   : > { %1023 = vmatpush.msra.mxu0 %v996_v58 }
 0x433   : > { %v591_v59 = vpop.f32.mrf.mxu2 }
 0x43f   : > { %v758_v1 = vpop.f32.mrf.mxu3 }
 0x441   : > { %v671_v60 = vpop.f32.mrf.mxu2 }
 0x442   : > { %675 = vrot.lane.b32.xlu2 %v671_v60, %s1779_s16 }
 0x449   : > { %v838_v61 = vpop.f32.mrf.mxu2 }
 0x44a   : > { %842 = vrot.lane.b32.xlu1 %v838_v61, %s1779_s16  ;;  %v995_v61 = vld [vmem:[%s1775_s10 + $0x18] sm:$0xff]  ;;  %s1040_s16 = scalar_lea.sflag [#allocation6], %s1591_s24 }
 0x44b   : > { %1024 = vmatpush.msra.mxu0 %v995_v61 }
 0x49c   : > { %v676_v62 = vpop.permute.xlu2 %675 }
 0x49d   : > { %v678_v63 = vsel %vm518_vm5, %v591_v59, %v676_v62 }
 0x49e   : > { %680 = vst.msk [vmem:[#allocation2] sm:$0xff] %vm679_vm8, %v678_v63  ;;  %v994_v63 = vld [vmem:[%s1775_s10 + $0x10] sm:$0xff] }
 0x49f   : > { %1025 = vmatpush.msra.mxu0 %v994_v63 }
 0x4bc   : > { %v843_v2 = vpop.permute.xlu1 %842 }
 0x4bd   : > { %v845_v3 = vsel %vm518_vm5, %v758_v1, %v843_v2  ;;  %vm850_vm5 = vcmask 261248  }
 0x4be   : > { %847 = vrot.lane.b32.xlu1 %v845_v3, %s1397_s20  ;;  %v993_v3 = vld [vmem:[%s1775_s10 + $0x8] sm:$0xff]  ;;  %s1066_s20 = sshll.u32 %s1595_s15, 4  ;;  %s1308_s15 = scalar_lea.hbm %s1778_s13, 64  ;;  %s1067_s20 = int_to_ptr.vmem [resolvable:$true] %s1066_s20 }
 0x4bf   : > { %1026 = vmatpush.msra.mxu0 %v993_v3  ;;  %p1310_p1 = scmp.lt.s32.totalorder %s1308_s15, %s1304_s23 }
 0x4c1   : > { %1027 = vmatpush.msra.mxu0 %v992_v5  ;;  %p1311_p2 = por %p1310_p1, %p1309_p0 }
 0x4c3   : > { %p1312_p3 = pnand %p1311_p2, %p1307_p13 }
 0x530   : > { %v848_v9 = vpop.permute.xlu1 %847 }
 0x531   : > { %851 = vst.msk [vmem:[#allocation2] sm:$0xff] %vm850_vm5, %v848_v9 }
 0x538   : > { %v852_v10 = vld [vmem:[#allocation2] sm:$0xff] }
 0x539   : > { %1187 = vmatmul.msk.f32.vlgmr.msrb.gmra.mxu1 %vm450_vm0, %v852_v10 }
 0x5b6   : > { %v881_v12 = vpop.f32.mrf.mxu1 }
 0x5b7   : > { %v882_v13 = vadd.f32 %v1259_v11, %v881_v12 }
 0x5b9   : > { %v1632_v14 = vadd.f32 %v882_v13, %v1522_v0  ;;  %v919_v0 = vld [vmem:[%s1773_s8 + $0x10] sm:$0xff] }
 0x5ba   : > { %941 = vmatpush.msra.mxu3 %v919_v0 }
 0x5bb   : > { %v887_v15 = vsel %vm450_vm0, %v1632_v14, 0.0 }
 0x5bc   : > { %888 = vadd.xlane.f32.xlu2 %v887_v15  ;;  %942 = vmatpush.msra.mxu3 %v918_v22 }
 0x5be   : > { %943 = vmatpush.msra.mxu3 %v917_v23 }
 0x62f   : > { %v889_v16 = vpop.xlane.xlu2 %888 }
 0x630   : > { %v890_v17 = vmul.f32 %v889_v16, %v1526_v8 }
 0x632   : > { %v891_v18 = vsub.f32 %v1632_v14, %v890_v17 }
 0x634   : > { %v892_v19 = vmul.f32 %v891_v18, %v891_v18 }
 0x636   : > { %v893_v20 = vsel %vm450_vm0, %v892_v19, 0.0 }
 0x637   : > { %894 = vadd.xlane.f32.xlu1 %v893_v20 }
 0x6aa   : > { %v895_v24 = vpop.xlane.xlu1 %894 }
 0x6ab   : > { %v896_v25 = vmul.f32 %v895_v24, %v1526_v8  ;;  %v1261_v8 = vld [vmem:[%s1797_s7] ss:$0 sm:$0xff] }
 0x6ad   : > { %v897_v26 = vadd.f32 1e-05, %v896_v25 }
 0x6af   : > { %1284 = vrsqrt.f32 %v897_v26  ;;  %vm904_vm10 = vweird.f32 %v897_v26 }
 0x6b5   : > { %v1285_v27 = vpop.eup %1284 }
 0x6b6   : > { %v899_v28 = vmul.f32 %v1285_v27, %v897_v26  ;;  %vm905_vm9 = vweird.f32 %v1285_v27 }
 0x6b7   : > { %vm906_vm11 = vmor %vm904_vm10, %vm905_vm9 }
 0x6b8   : > { %v900_v29 = vmul.f32 %v1285_v27, %v899_v28 }
 0x6ba   : > { %v901_v30 = vmul.f32 0.5, %v900_v29 }
 0x6bc   : > { %v902_v31 = vsub.f32 1.5, %v901_v30 }
 0x6be   : > { %v903_v32 = vmul.f32 %v1285_v27, %v902_v31 }
 0x6c0   : > { %v907_v34 = vsel %vm906_vm11, %v1285_v27, %v903_v32 }
 0x6c1   : > { %v908_v35 = vmul.f32 %v907_v34, %v891_v18 }
 0x6c3   : > { %v912_v36 = vmul.f32 %v1260_v33, %v908_v35 }
 0x6c5   : > { %v916_v37 = vadd.f32 %v1261_v8, %v912_v36 }
 0x6c7   : > { %1188 = vmatmul.msk.f32.vlgmr.msra.gmra.mxu3 %vm450_vm0, %v916_v37 }
 0x74a   : > { %v945_v45 = vpop.f32.mrf.mxu3 }
 0x74b   : > { %v946_v46 = vadd.f32 %v1262_v41, %v945_v45 }
 0x74d   : > { %v949_v48 = vmul.f32 0.70710677, %v946_v46  ;;  %v948_v31 = vmul.f32 0.5, %v946_v46 }
 0x74f   : > { %v950_v50 = vmul.f32 %v949_v48, %v949_v48 }
 0x751   : > { %v951_v52 = vmin.f32 %v950_v50, 16.0 }
 0x753   : > { %v952_v54 = vmul.f32 2.1237322e-06, %v951_v52  ;;  %v963_v56 = vmul.f32 3.8918573e-05, %v951_v52 }
 0x755   : > { %v953_v57 = vadd.f32 0.00028619796, %v952_v54  ;;  %v964_v59 = vadd.f32 0.001143296, %v963_v56 }
 0x757   : > { %v954_v60 = vmul.f32 %v953_v57, %v951_v52  ;;  %v965_v62 = vmul.f32 %v964_v59, %v951_v52 }
 0x759   : > { %v966_v1 = vadd.f32 0.014752088, %v965_v62  ;;  %v955_v2 = vadd.f32 0.0036580483, %v954_v60 }
 0x75b   : > { %v967_v4 = vmul.f32 %v966_v1, %v951_v52  ;;  %v956_v7 = vmul.f32 %v955_v2, %v951_v52 }
 0x75d   : > { %v968_v6 = vadd.f32 0.112945676, %v967_v4  ;;  %v957_v11 = vadd.f32 0.05243302, %v956_v7 }
 0x75f   : > { %v969_v9 = vmul.f32 %v968_v6, %v951_v52  ;;  %v958_v15 = vmul.f32 %v957_v11, %v951_v52 }
 0x761   : > { %v970_v10 = vadd.f32 0.4994258, %v969_v9  ;;  %v959_v16 = vadd.f32 0.18741608, %v958_v15 }
 0x763   : > { %v971_v12 = vmul.f32 %v970_v10, %v951_v52  ;;  %v960_v18 = vmul.f32 %v959_v16, %v951_v52 }
 0x765   : > { %v972_v13 = vadd.f32 1.0, %v971_v12  ;;  %v961_v0 = vadd.f32 1.1283791, %v960_v18 }
 0x767   : > { %1286 = vrcp.f32 %v972_v13  ;;  %v984_v21 = vand.u32 2147483648, %v972_v13  ;;  %v982_v23 = vand.u32 2147483647, %v972_v13  ;;  %vm978_vm13 = vweird.f32 %v972_v13 }
 0x768   : > { %v962_v26 = vmul.f32 %v961_v0, %v949_v48 }
 0x769   : > { %v985_v25 = vor.u32 1.1754944e-38, %v984_v21  ;;  %vm983_vm15 = vcmp.eq.f32.partialorder %v982_v23, 8.507059e+37 }
 0x76d   : > { %v1287_v17 = vpop.eup %1286 }
 0x76e   : > { %v974_v19 = vmul.f32 %v1287_v17, %v972_v13  ;;  %vm979_vm12 = vweird.f32 %v1287_v17 }
 0x76f   : > { %vm980_vm14 = vmor %vm978_vm13, %vm979_vm12 }
 0x770   : > { %v975_v20 = vsub.f32 1.0, %v974_v19 }
 0x772   : > { %v976_v22 = vmul.f32 %v1287_v17, %v975_v20 }
 0x774   : > { %v977_v24 = vadd.f32 %v1287_v17, %v976_v22 }
 0x776   : > { %v981_v27 = vsel %vm980_vm14, %v1287_v17, %v977_v24 }
 0x777   : > { %v986_v28 = vsel %vm983_vm15, %v985_v25, %v981_v27 }
 0x778   : > { %v987_v29 = vmul.f32 %v986_v28, %v962_v26 }
 0x77a   : > { %v1189_v30 = vclamps-f32 %v987_v29, 1.0 }
 0x77c   : > { %v990_v32 = vadd.f32 1.0, %v1189_v30 }
 0x77e   : > { %v991_v33 = vmul.f32 %v990_v32, %v948_v31 }
 0x780   : > { %1028 = vmatmul.f32.vlgmr.msra.gmra.mxu0 %v991_v33 }
 0x781   : > { %1315 = shalt.err (!%p1312_p3)
}
 0x782   : > { %s1398_s21 = smov 128   ;;  %s1798_s3 = smov 8   ;;  %v1263_v34 = vld [vmem:[%s1776_s11] ss:$0 sm:$0xff] }
 0x783   : > { %1199 = dma.vmem_to_hbm [thread:$0]  (%p1507_p5), %s1067_s20, 512, %s1069_s2, %s1040_s16, %s1398_s21, %s1398_s21, %s1798_s3  }
 0x784   : > { %s1168_s0 = sshll.u32 %s1591_s24, 3  ;;  %s1192_s1 = sshll.u32 %s1490_s29, 3 }
 0x785   : > { %s1050_s22 = scalar_lea.hbm %s1777_s12, %s1192_s1  ;;  %s435_s23 = scalar_lea.vmem [#allocation3], %s1168_s0 }
 0x786   : > { %s1052_s15 = sshll.u32 %s435_s23, 4  ;;  %s1054_s7 = sshll.u32 %s1050_s22, 4  ;;  %s1053_s15 = int_to_ptr.vmem [resolvable:$true] %s1052_s15  ;;  %s1055_s7 = int_to_ptr.hbm [resolvable:$true] %s1054_s7 }
 0x787   : > { %s1035_s29 = scalar_lea.sflag [#allocation4], %s1591_s24  ;;  %s1330_s20 = sshra.s32 %s1055_s7, 4  ;;  %s1331_s20 = int_to_ptr.hbm [resolvable:$true] %s1330_s20 }
 0x788   : > { %s1332_s2 = scalar_lea.hbm %s1331_s20, 8  ;;  %s1336_s3 = scalar_lea.hbm %s1777_s12, 16 }
 0x789   : > { %p1333_p4 = scmp.ne.s32.totalorder %s1331_s20, %s1332_s2  ;;  %p1337_p9 = scmp.lt.s32.totalorder %s1331_s20, %s1777_s12 }
 0x78a   : > { %p1338_p10 = scmp.lt.s32.totalorder %s1336_s3, %s1332_s2 }
 0x78b   : > { %p1334_p7 = pnand %p1333_p4, %p1507_p5 }
 0x78c   : > { %p1339_p11 = por %p1338_p10, %p1337_p9 }
 0x78d   : > { %p1335_p8 = pneg %p1334_p7 }
 0x78f   : > { %p1340_p12 = pnand %p1339_p11, %p1335_p8 }
 0x7fd   : > { %v1029_v35 = vpop.f32.mrf.mxu0 }
 0x7fe   : > { %v1030_v8 = vadd.f32 %v1263_v34, %v1029_v35 }
 0x800   : > { %v1032_v36 = vadd.f32 %v1030_v8, %v1632_v14 }
 0x802   : > { %1033 = vst.msk [vmem:[%s435_s23] sm:$0xff] %vm450_vm0, %v1032_v36 }
 0x803   : > { %1343 = shalt.err (!%p1340_p12)
}
 0x804   : > { %1198 = dma.vmem_to_hbm [thread:$0]  (%p1507_p5), %s1053_s15, 128, %s1055_s7, %s1035_s29  }
 0x805 PF: > { %p1209_p13 = scmp.ge.s32.totalorder %s1382_s28, 2  ;;  %s1083_s24 = sand.u32 1, %s1370_s25  }
 0x806   : > { %s1084_s4 = scalar_lea.sflag [#allocation4], %s1083_s24 }
 0x807   : > { %p1203_p0 = pnand %p1209_p13, %p1511_p6 }
 0x809   : > { %p1204_p1 = pneg %p1203_p0 }
 0x80b   : > { %1361 = dma.done.wait (%p1204_p1), %s1084_s4, 128  }
 0x80c   : > { %1363 = vsyncadd (%p1204_p1), %s1084_s4, 4294967168  ;;  %s1094_s30 = scalar_lea.sflag [#allocation6], %s1083_s24 }
 0x80d   : > { %1365 = dma.done.wait (%p1204_p1), %s1094_s30, 512  }
 0x80e   : > { %1367 = vsyncadd (%p1204_p1), %s1094_s30, 4294966784  ;;  %p27_p5 = scmp.ge.s32.totalorder %s1494_s14, 4   ;;  %s1799_s25 = smov %s1374_s26 }
 0x80f   : > { %s1800_s26 = smov %s1378_s27  ;;  %s1801_s27 = smov %s1505_s17 }
 0x810   : > { %s1802_s28 = smov %s1494_s14  ;;  %29 = sbr.rel (!%p27_p5) target bundleno = 14 (0xe), region = 123 }
 0x815   :  { %1100 = vsyncpa [#allocation4], 1 }
 0x816   :  { %1102 = vsyncpa [#allocation4 + $0x1], 1 }
 0x817   :  { %1103 = vsyncpa [#allocation6], 1 }
 0x818   :  { %1105 = vsyncpa [#allocation6 + $0x1], 1 }

// kernel: tpu_custom_call.1
= control target key start
LH: loop header
LB: loop body
LE: loop exit
PB: predicated region body
PF: predicated region fallthrough
CT: control target
= control target key end

     0   :  { %s1765_s0 = inlined_call_operand.vmem [shape: f32[2,8,32], index: 0, kind: input, shape index: {}]   ;;  %s1766_s1 = inlined_call_operand.vmem [shape: f32[1,32], index: 1, kind: input, shape index: {}]   ;;  %s1767_s2 = inlined_call_operand.vmem [shape: f32[1,32], index: 2, kind: input, shape index: {}]   ;;  %s1768_s3 = inlined_call_operand.vmem [shape: f32[32,96], index: 3, kind: input, shape index: {}]   ;;  %s1769_s4 = inlined_call_operand.vmem [shape: f32[32,32], index: 4, kind: input, shape index: {}]   ;;  %s1770_s5 = inlined_call_operand.vmem [shape: f32[1,32], index: 5, kind: input, shape index: {}]   ;;  %s1771_s6 = inlined_call_operand.vmem [shape: f32[1,32], index: 6, kind: input, shape index: {}]   ;;  %s1772_s7 = inlined_call_operand.vmem [shape: f32[1,32], index: 7, kind: input, shape index: {}]   ;;  %s1773_s8 = inlined_call_operand.vmem [shape: f32[32,128], index: 8, kind: input, shape index: {}]   ;;  %s1774_s9 = inlined_call_operand.vmem [shape: f32[1,128], index: 9, kind: input, shape index: {}]   ;;  %s1775_s10 = inlined_call_operand.vmem [shape: f32[128,32], index: 10, kind: input, shape index: {}]   ;;  %s1776_s11 = inlined_call_operand.vmem [shape: f32[1,32], index: 11, kind: input, shape index: {}]   ;;  %s1777_s12 = inlined_call_operand.hbm [shape: f32[2,8,32], index: 12, kind: output, shape index: {0}]   ;;  %s1778_s13 = inlined_call_operand.hbm [shape: f32[2,4,8,8], index: 13, kind: output, shape index: {1}]  }
   0x1   :  { %1780 = sst [smem:[#allocation9_spill]] %s1765_s0 }
   0x2   :  { %1781 = sst [smem:[#allocation10_spill]] %s1766_s1 }
   0x3   :  { %1782 = sst [smem:[#allocation11_spill]] %s1767_s2 }
   0x4   :  { %1783 = sst [smem:[#allocation12_spill]] %s1768_s3 }
   0x5   :  { %1784 = sst [smem:[#allocation13_spill]] %s1769_s4 }
   0x6   :  { %1785 = sst [smem:[#allocation14_spill]] %s1770_s5 }
   0x7   :  { %1786 = sst [smem:[#allocation15_spill]] %s1771_s6 }
   0x8   :  { %1787 = sst [smem:[#allocation16_spill]] %s1772_s7 }
   0x9   :  { %19 = vsyncpa [#allocation4], 0 }
   0xa   :  { %21 = vsyncpa [#allocation4 + $0x1], 0 }
   0xb   :  { %22 = vsyncpa [#allocation6], 0 }
   0xc   :  { %24 = vsyncpa [#allocation6 + $0x1], 0  ;;  %s1469_s25 = smov 0   ;;  %s1471_s26 = smov 0  }
   0xd   :  { %s1473_s27 = smov 0   ;;  %s1475_s28 = smov 0  }
   0xe LB: > { %s1490_s29 = sadd.s32 4294967295, %s1382_s28   ;;  %s1164_s30 = sadd.s32 4294967294, %s1382_s28   ;;  %s1382_s28 = sphi %s1475_s28, %s1802_s28   ;;  %s1378_s27 = sphi %s1473_s27, %s1801_s27   ;;  %s1374_s26 = sphi %s1471_s26, %s1800_s26   ;;  %s1370_s25 = sphi %s1469_s25, %s1799_s25  }
   0xf   : > { %s1494_s14 = sadd.s32 1, %s1382_s28   ;;  %s294_s15 = sadd.s32 1, %s1378_s27 }
  0x10   : > { %s291_s16 = ssub.s32 %s1382_s28, %s1494_s14  ;;  %p304_p0 = scmp.ne.s32.totalorder %s1378_s27, %s1374_s26 }
  0x11   : > { %p292_p1 = scmp.eq.s32.totalorder %s291_s16, 0  ;;  %p305_p2 = scmp.eq.s32.totalorder %s1490_s29, 1 }
  0x12   : > { %p310_p3 = scmp.ne.s32.totalorder %s1374_s26, %s1370_s25  ;;  %p311_p4 = scmp.eq.s32.totalorder %s1164_s30, 1 }
  0x13   : > { %s1505_s17 = scalar_select %p292_p1, %s1378_s27, %s294_s15  }
  0x14   : > { %p1507_p5 = por %p305_p2, %p304_p0  ;;  %p1511_p6 = por %p311_p4, %p310_p3 }
  0x15   : > { %p1167_p7 = scmp.ge.s32.totalorder %s1382_s28, 1  ;;  %p395_p8 = scmp.lt.s32.totalorder %s1382_s28, 3 }
  0x17   : > { %p396_p9 = pnand %p1167_p7, %p395_p8 }
  0x18   : > { %p443_p10 = scmp.lt.s32.totalorder (!%p396_p9), %s1490_s29, 1  ;;  %s1790_s0 = sld [smem:[#allocation9_spill]] (!%p396_p9) }
  0x19   : > { %399 = sbr.rel (%p396_p9) target bundleno = 2053 (0x805), region = 68  ;;  %s1791_s3 = sld [smem:[#allocation12_spill]] (!%p396_p9) }
  0x1a   : > { %s1792_s1 = sld [smem:[#allocation10_spill]] (!%p396_p9)  ;;  %s1386_s22 = smov (!%p396_p9), 120  }
  0x1b   : > { %s1793_s2 = sld [smem:[#allocation11_spill]] (!%p396_p9)  ;;  %s1387_s23 = smov (!%p396_p9), 96  }
  0x1c   : > { %s1389_s30 = smov (!%p396_p9), 88   ;;  %s1390_s15 = smov (!%p396_p9), 104  }
  0x1d   : > { %s1391_s16 = smov (!%p396_p9), 72   ;;  %s1794_s4 = sld [smem:[#allocation13_spill]] (!%p396_p9) }
  0x1e   : > { %s444_s20 = scalar_select %p443_p10, %s1490_s29, 1  ;;  %vm450_vm0 = vcmask 261120   ;;  %v1384_v2 = vmov 32.0   ;;  %vm518_vm5 = vcmask 64512  }
  0x1f   : > { %1264 = vrcp.f32 %v1384_v2  ;;  %v491_v14 = vld [vmem:[%s1791_s3 + $0x18] sm:$0xff]  ;;  %v490_v15 = vld [vmem:[%s1791_s3 + $0x10] sm:$0xff]  ;;  %v489_v16 = vld [vmem:[%s1791_s3 + $0x8] sm:$0xff]  ;;  %s1795_s5 = sld [smem:[#allocation14_spill]] }
  0x20   : > { %s1170_s21 = sshll.u32 %s444_s20, 3  ;;  %507 = vmatpush.msra.mxu2 %v491_v14  ;;  %v488_v17 = vld [vmem:[%s1791_s3] sm:$0xff]  ;;  %s1392_s20 = smov 64  }
  0x21   : > { %s446_s24 = scalar_lea.vmem %s1790_s0, %s1170_s21  ;;  %v1257_v27 = vld [vmem:[%s1792_s1] ss:$0 sm:$0xff]  ;;  %s1385_s21 = smov 112  }
  0x22   : > { %v1522_v0 = vld [vmem:[%s446_s24] sm:$0xff]  ;;  %508 = vmatpush.msra.mxu2 %v490_v15  ;;  %s1388_s24 = smov 80   ;;  %s1796_s6 = sld [smem:[#allocation15_spill]] }
  0x23   : > { %v451_v1 = vsel %vm450_vm0, %v1522_v0, 0.0  ;;  %v1258_v30 = vld [vmem:[%s1793_s2] ss:$0 sm:$0xff]  ;;  %s1797_s7 = sld [smem:[#allocation16_spill]] }
  0x24   : > { %452 = vadd.xlane.f32.xlu0 %v451_v1  ;;  %509 = vmatpush.msra.mxu2 %v489_v16 }
  0x25   : > { %v1265_v3 = vpop.eup %1264 }
  0x26   : > { %v455_v4 = vmul.f32 32.0, %v1265_v3  ;;  %vm459_vm1 = vweird.f32 %v1265_v3  ;;  %510 = vmatpush.msra.mxu2 %v488_v17 }
  0x28   : > { %v456_v5 = vsub.f32 1.0, %v455_v4 }
  0x2a   : > { %v457_v6 = vmul.f32 %v1265_v3, %v456_v5 }
  0x2c   : > { %v458_v7 = vadd.f32 %v1265_v3, %v457_v6 }
  0x2e   : > { %v1526_v8 = vsel %vm459_vm1, %v1265_v3, %v458_v7 }
  0x97   : > { %v453_v9 = vpop.xlane.xlu0 %452 }
  0x98   : > { %v461_v10 = vmul.f32 %v1526_v8, %v453_v9 }
  0x9a   : > { %v462_v11 = vsub.f32 %v1522_v0, %v461_v10 }
  0x9c   : > { %v463_v12 = vmul.f32 %v462_v11, %v462_v11 }
  0x9e   : > { %v464_v13 = vsel %vm450_vm0, %v463_v12, 0.0 }
  0x9f   : > { %465 = vadd.xlane.f32.xlu0 %v464_v13 }
 0x112   : > { %v466_v18 = vpop.xlane.xlu0 %465 }
 0x113   : > { %v467_v19 = vmul.f32 %v466_v18, %v1526_v8 }
 0x115   : > { %v468_v20 = vadd.f32 1e-05, %v467_v19 }
 0x117   : > { %1266 = vrsqrt.f32 %v468_v20  ;;  %vm475_vm3 = vweird.f32 %v468_v20 }
 0x11d   : > { %v1267_v21 = vpop.eup %1266 }
 0x11e   : > { %v470_v22 = vmul.f32 %v1267_v21, %v468_v20  ;;  %vm476_vm2 = vweird.f32 %v1267_v21 }
 0x11f   : > { %vm477_vm4 = vmor %vm475_vm3, %vm476_vm2 }
 0x120   : > { %v471_v23 = vmul.f32 %v1267_v21, %v470_v22 }
 0x122   : > { %v472_v24 = vmul.f32 0.5, %v471_v23 }
 0x124   : > { %v473_v25 = vsub.f32 1.5, %v472_v24 }
 0x126   : > { %v474_v26 = vmul.f32 %v1267_v21, %v473_v25 }
 0x128   : > { %v478_v28 = vsel %vm477_vm4, %v1267_v21, %v474_v26 }
 0x129   : > { %v479_v29 = vmul.f32 %v478_v28, %v462_v11 }
 0x12b   : > { %v483_v31 = vmul.f32 %v1257_v27, %v479_v29 }
 0x12d   : > { %v487_v32 = vadd.f32 %v1258_v30, %v483_v31 }
 0x12f   : > { %1171 = vmatmul.msk.f32.vlgmr.msra.gmra.mxu2 %vm450_vm0, %v487_v32 }
 0x1b2   : > { %v1551_v33 = vpop.f32.mrf.mxu2 }
 0x1b3   : > { %681 = vrot.lane.b32.xlu0 %v1551_v33, %s1385_s21  ;;  %594 = vrot.lane.b32.xlu2 %v1551_v33, %s1386_s22  ;;  %s1393_s21 = smov 56   ;;  %s1394_s22 = smov 40  }
 0x1b4   : > { %516 = vrot.lane.b32.xlu1 %v1551_v33, %s1387_s23  ;;  %s1395_s23 = smov 48  }
 0x1bb   : > { %683 = vrot.lane.b32.xlu2 %v1551_v33, %s1388_s24  ;;  %s1591_s24 = sand.u32 1, %s1374_s26  }
 0x1bc   : > { %596 = vrot.lane.b32.xlu1 %v1551_v33, %s1389_s30  ;;  %s1169_s30 = sshll.u32 %s1591_s24, 5 }
 0x1c3   : > { %761 = vrot.lane.b32.xlu2 %v1551_v33, %s1390_s15  ;;  %s1595_s15 = scalar_lea.vmem [#allocation5], %s1169_s30 }
 0x1c4   : > { %763 = vrot.lane.b32.xlu1 %v1551_v33, %s1391_s16  ;;  %s1779_s16 = smov 8  }
 0x20d   : > { %v595_v34 = vpop.permute.xlu2 %594 }
 0x215   : > { %v684_v36 = vpop.permute.xlu2 %683 }
 0x21d   : > { %v762_v40 = vpop.permute.xlu2 %761 }
 0x225   : > { %v682_v38 = vpop.permute.xlu0 %681 }
 0x226   : > { %v517_v35 = vpop.permute.xlu1 %516 }
 0x227   : > { %1172 = vmatpush.xpose.msk.msra.mxu1 %vm518_vm5, %v517_v35 }
 0x22a   : > { %1173 = vmatmul.msk.f32.vlgmr.msra.gmra.mxu1 %vm518_vm5, %v1551_v33 }
 0x22b   : > { %1179 = vmatpush.xpose.msk.msrb.mxu1 %vm518_vm5, %v684_v36 }
 0x22e   : > { %v597_v37 = vpop.permute.xlu1 %596 }
 0x22f   : > { %1175 = vmatpush.xpose.msk.msra.mxu3 %vm518_vm5, %v597_v37 }
 0x232   : > { %1176 = vmatmul.msk.f32.vlgmr.msra.gmra.mxu3 %vm518_vm5, %v595_v34  ;;  %1180 = vmatmul.msk.f32.vlgmr.msrb.gmra.mxu1 %vm518_vm5, %v682_v38 }
 0x236   : > { %v764_v39 = vpop.permute.xlu1 %763 }
 0x237   : > { %1183 = vmatpush.xpose.msk.msra.mxu1 %vm518_vm5, %v764_v39 }
 0x23a   : > { %1184 = vmatmul.msk.f32.vlgmr.msra.gmra.mxu1 %vm518_vm5, %v762_v40 }
 0x2a7   : > { %v540_v41 = vpop.f32.mrf.mxu1 }
 0x2a8   : > { %v543_v42 = vsel %vm518_vm5, %v540_v41, -inf }
 0x2a9   : > { %544 = vmax.xlane.f32.xlu1 %v543_v42 }
 0x2af   : > { %v706_v43 = vpop.f32.mrf.mxu1 }
 0x2b0   : > { %v709_v44 = vsel %vm518_vm5, %v706_v43, -inf }
 0x2b1   : > { %710 = vmax.xlane.f32.xlu1 %v709_v44 }
 0x2b5   : > { %v619_v45 = vpop.f32.mrf.mxu3 }
 0x2b6   : > { %v622_v46 = vsel %vm518_vm5, %v619_v45, -inf }
 0x2b7   : > { %623 = vmax.xlane.f32.xlu2 %v622_v46  ;;  %v786_v47 = vpop.f32.mrf.mxu1 }
 0x2b8   : > { %v789_v48 = vsel %vm518_vm5, %v786_v47, -inf }
 0x2b9   : > { %790 = vmax.xlane.f32.xlu0 %v789_v48 }
 0x2cd   : > { %568 = vrot.lane.b32.xlu0 %v1551_v33, %s1392_s20  ;;  %s1397_s20 = smov 16  }
 0x31c   : > { %v545_v49 = vpop.xlane.xlu1 %544 }
 0x31d   : > { %v546_v50 = vsub.f32 %v540_v41, %v545_v49 }
 0x31f   : > { %v547_v51 = vmul.f32 1.442695, %v546_v50 }
 0x321   : > { %1268 = vpow2.f32 %v547_v51 }
 0x324   : > { %v711_v52 = vpop.xlane.xlu1 %710 }
 0x325   : > { %v712_v53 = vsub.f32 %v706_v43, %v711_v52 }
 0x327   : > { %v1269_v54 = vpop.eup %1268  ;;  %v713_v55 = vmul.f32 1.442695, %v712_v53 }
 0x328   : > { %v549_v56 = vsel %vm518_vm5, %v1269_v54, 0.0 }
 0x329   : > { %1270 = vpow2.f32 %v713_v55  ;;  %550 = vadd.xlane.f32.xlu2 %v549_v56 }
 0x32a   : > { %v624_v57 = vpop.xlane.xlu2 %623 }
 0x32b   : > { %v625_v58 = vsub.f32 %v619_v45, %v624_v57 }
 0x32c   : > { %v791_v59 = vpop.xlane.xlu0 %790 }
 0x32d   : > { %v626_v60 = vmul.f32 1.442695, %v625_v58  ;;  %v792_v61 = vsub.f32 %v786_v47, %v791_v59 }
 0x32f   : > { %v1575_v62 = vpop.eup %1270  ;;  %1272 = vpow2.f32 %v626_v60  ;;  %v793_v63 = vmul.f32 1.442695, %v792_v61 }
 0x330   : > { %v715_v1 = vsel %vm518_vm5, %v1575_v62, 0.0 }
 0x331   : > { %1274 = vpow2.f32 %v793_v63  ;;  %716 = vadd.xlane.f32.xlu0 %v715_v1 }
 0x335   : > { %v1579_v2 = vpop.eup %1272 }
 0x336   : > { %v628_v3 = vsel %vm518_vm5, %v1579_v2, 0.0 }
 0x337   : > { %v1583_v4 = vpop.eup %1274  ;;  %629 = vadd.xlane.f32.xlu2 %v628_v3 }
 0x338   : > { %v795_v5 = vsel %vm518_vm5, %v1583_v4, 0.0 }
 0x339   : > { %796 = vadd.xlane.f32.xlu1 %v795_v5  ;;  %v855_v5 = vld [vmem:[%s1794_s4 + $0x10] sm:$0xff] }
 0x33f   : > { %v569_v6 = vpop.permute.xlu0 %568 }
 0x340   : > { %589 = vmatpush.msrb.mxu2 %v569_v6  ;;  %v854_v6 = vld [vmem:[%s1794_s4 + $0x8] sm:$0xff] }
 0x34f   : > { %648 = vrot.lane.b32.xlu2 %v1551_v33, %s1393_s21  ;;  %s1197_s21 = sshll.u32 %s1490_s29, 5 }
 0x350   : > { %s1065_s1 = scalar_lea.hbm %s1778_s13, %s1197_s21 }
 0x351   : > { %s1068_s2 = sshll.u32 %s1065_s1, 4  ;;  %s1069_s2 = int_to_ptr.hbm [resolvable:$true] %s1068_s2 }
 0x352   : > { %815 = vrot.lane.b32.xlu1 %v1551_v33, %s1394_s22  ;;  %s1302_s22 = sshra.s32 %s1069_s2, 4  ;;  %s1303_s22 = int_to_ptr.hbm [resolvable:$true] %s1302_s22 }
 0x353   : > { %p1309_p0 = scmp.lt.s32.totalorder %s1303_s22, %s1778_s13 }
 0x357   : > { %735 = vrot.lane.b32.xlu2 %v1551_v33, %s1395_s23  ;;  %s1304_s23 = scalar_lea.hbm %s1303_s22, 32 }
 0x358   : > { %p1305_p11 = scmp.ne.s32.totalorder %s1303_s22, %s1304_s23 }
 0x35a   : > { %p1306_p12 = pnand %p1305_p11, %p1507_p5 }
 0x35c   : > { %p1307_p13 = pneg %p1306_p12 }
 0x39c   : > { %v551_v7 = vpop.xlane.xlu2 %550 }
 0x39d   : > { %1276 = vrcp.f32 %v551_v7  ;;  %v563_v14 = vand.u32 2147483648, %v551_v7  ;;  %v561_v15 = vand.u32 2147483647, %v551_v7  ;;  %vm557_vm7 = vweird.f32 %v551_v7 }
 0x39f   : > { %v564_v19 = vor.u32 1.1754944e-38, %v563_v14  ;;  %vm562_vm9 = vcmp.eq.f32.partialorder %v561_v15, 8.507059e+37 }
 0x3a3   : > { %v1277_v9 = vpop.eup %1276 }
 0x3a4   : > { %v553_v10 = vmul.f32 %v1277_v9, %v551_v7  ;;  %v717_v11 = vpop.xlane.xlu0 %716  ;;  %vm558_vm6 = vweird.f32 %v1277_v9  ;;  %v853_v7 = vld [vmem:[%s1794_s4] sm:$0xff] }
 0x3a5   : > { %1278 = vrcp.f32 %v717_v11  ;;  %vm559_vm8 = vmor %vm557_vm7, %vm558_vm6  ;;  %v729_v25 = vand.u32 2147483648, %v717_v11  ;;  %v727_v28 = vand.u32 2147483647, %v717_v11  ;;  %vm723_vm11 = vweird.f32 %v717_v11 }
 0x3a6   : > { %v554_v12 = vsub.f32 1.0, %v553_v10 }
 0x3a7   : > { %v730_v34 = vor.u32 1.1754944e-38, %v729_v25  ;;  %vm728_vm13 = vcmp.eq.f32.partialorder %v727_v28, 8.507059e+37 }
 0x3a8   : > { %v555_v13 = vmul.f32 %v1277_v9, %v554_v12 }
 0x3aa   : > { %v556_v16 = vadd.f32 %v1277_v9, %v555_v13  ;;  %v630_v17 = vpop.xlane.xlu2 %629 }
 0x3ab   : > { %v1279_v18 = vpop.eup %1278  ;;  %1280 = vrcp.f32 %v630_v17  ;;  %v640_v38 = vand.u32 2147483647, %v630_v17  ;;  %v642_v39 = vand.u32 2147483648, %v630_v17  ;;  %vm636_vm15 = vweird.f32 %v630_v17 }
 0x3ac   : > { %v719_v20 = vmul.f32 %v1279_v18, %v717_v11  ;;  %v797_v21 = vpop.xlane.xlu1 %796  ;;  %v560_v22 = vsel %vm559_vm8, %v1277_v9, %v556_v16  ;;  %vm724_vm10 = vweird.f32 %v1279_v18  ;;  %vm679_vm8 = vcmask 130048   ;;  %v1259_v11 = vld [vmem:[%s1795_s5] ss:$0 sm:$0xff] }
 0x3ad   : > { %1282 = vrcp.f32 %v797_v21  ;;  %v565_v24 = vsel %vm562_vm9, %v564_v19, %v560_v22  ;;  %vm725_vm12 = vmor %vm723_vm11, %vm724_vm10  ;;  %v809_v44 = vand.u32 2147483648, %v797_v21  ;;  %v807_v47 = vand.u32 2147483647, %v797_v21  ;;  %v918_v22 = vld [vmem:[%s1773_s8 + $0x8] sm:$0xff] }
 0x3ae   : > { %v720_v23 = vsub.f32 1.0, %v719_v20  ;;  %v566_v26 = vmul.f32 %v1269_v54, %v565_v24  ;;  %v643_v48 = vor.u32 1.1754944e-38, %v642_v39  ;;  %vm641_vm3 = vcmp.eq.f32.partialorder %v640_v38, 8.507059e+37  ;;  %v1007_v38 = vld [vmem:[%s1775_s10 + $0x78] sm:$0xff]  ;;  %v1006_v39 = vld [vmem:[%s1775_s10 + $0x70] sm:$0xff] }
 0x3af   : > { %vm803_vm4 = vweird.f32 %v797_v21  ;;  %v810_v53 = vor.u32 1.1754944e-38, %v809_v44  ;;  %vm808_vm7 = vcmp.eq.f32.partialorder %v807_v47, 8.507059e+37  ;;  %1012 = vmatpush.msra.mxu0 %v1007_v38  ;;  %v1002_v44 = vld [vmem:[%s1775_s10 + $0x50] sm:$0xff]  ;;  %v1001_v47 = vld [vmem:[%s1775_s10 + $0x48] sm:$0xff] }
 0x3b0   : > { %v721_v27 = vmul.f32 %v1279_v18, %v720_v23  ;;  %1174 = vmatmul.msk.f32.vlgmr.msrb.gmra.mxu2 %vm518_vm5, %v566_v26  ;;  %567 = vst.msk [vmem:[%s1595_s15] sm:$0xff] %vm518_vm5, %v566_v26  ;;  %v917_v23 = vld [vmem:[%s1773_s8] sm:$0xff] }
 0x3b1   : > { %v1281_v29 = vpop.eup %1280  ;;  %1013 = vmatpush.msra.mxu0 %v1006_v39 }
 0x3b2   : > { %v722_v30 = vadd.f32 %v1279_v18, %v721_v27  ;;  %v632_v31 = vmul.f32 %v1281_v29, %v630_v17  ;;  %v649_v32 = vpop.permute.xlu2 %648  ;;  %vm637_vm14 = vweird.f32 %v1281_v29 }
 0x3b3   : > { %v1283_v33 = vpop.eup %1282  ;;  %669 = vmatpush.msra.mxu2 %v649_v32  ;;  %vm638_vm2 = vmor %vm636_vm15, %vm637_vm14 }
 0x3b4   : > { %v726_v35 = vsel %vm725_vm12, %v1279_v18, %v722_v30  ;;  %v633_v36 = vsub.f32 1.0, %v632_v31  ;;  %v799_v37 = vmul.f32 %v1283_v33, %v797_v21  ;;  %vm804_vm1 = vweird.f32 %v1283_v33  ;;  %v920_v21 = vld [vmem:[%s1773_s8 + $0x18] sm:$0xff] }
 0x3b5   : > { %v731_v40 = vsel %vm728_vm13, %v730_v34, %v726_v35  ;;  %vm805_vm6 = vmor %vm803_vm4, %vm804_vm1 }
 0x3b6   : > { %v634_v41 = vmul.f32 %v1281_v29, %v633_v36  ;;  %v800_v42 = vsub.f32 1.0, %v799_v37  ;;  %v732_v43 = vmul.f32 %v1575_v62, %v731_v40  ;;  %v1005_v40 = vld [vmem:[%s1775_s10 + $0x68] sm:$0xff] }
 0x3b7   : > { %1014 = vmatpush.msra.mxu0 %v1005_v40 }
 0x3b8   : > { %v635_v45 = vadd.f32 %v1281_v29, %v634_v41  ;;  %v801_v46 = vmul.f32 %v1283_v33, %v800_v42  ;;  %1181 = vst.msk [vmem:[%s1595_s15 + $0x10] sm:$0xff] %vm518_vm5, %v732_v43  ;;  %v1262_v41 = vld [vmem:[%s1774_s9] ss:$0 sm:$0xff] }
 0x3b9   : > { %v1004_v42 = vld [vmem:[%s1775_s10 + $0x60] sm:$0xff] }
 0x3ba   : > { %v639_v49 = vsel %vm638_vm2, %v1281_v29, %v635_v45  ;;  %v802_v50 = vadd.f32 %v1283_v33, %v801_v46  ;;  %v736_v51 = vpop.permute.xlu2 %735  ;;  %1015 = vmatpush.msra.mxu0 %v1004_v42 }
 0x3bb   : > { %v644_v52 = vsel %vm641_vm3, %v643_v48, %v639_v49  ;;  %756 = vmatpush.msrb.mxu3 %v736_v51  ;;  %v1000_v49 = vld [vmem:[%s1775_s10 + $0x40] sm:$0xff]  ;;  %v999_v51 = vld [vmem:[%s1775_s10 + $0x38] sm:$0xff] }
 0x3bc   : > { %v806_v54 = vsel %vm805_vm6, %v1283_v33, %v802_v50  ;;  %1182 = vmatmul.msk.f32.vlgmr.msrb.gmra.mxu3 %vm518_vm5, %v732_v43  ;;  %v645_v55 = vmul.f32 %v1579_v2, %v644_v52  ;;  %v1260_v33 = vld [vmem:[%s1796_s6] ss:$0 sm:$0xff]  ;;  %v1003_v43 = vld [vmem:[%s1775_s10 + $0x58] sm:$0xff] }
 0x3bd   : > { %v811_v56 = vsel %vm808_vm7, %v810_v53, %v806_v54  ;;  %940 = vmatpush.msra.mxu3 %v920_v21  ;;  %1016 = vmatpush.msra.mxu0 %v1003_v43  ;;  %v998_v53 = vld [vmem:[%s1775_s10 + $0x30] sm:$0xff] }
 0x3be   : > { %1178 = vmatmul.msk.f32.vlgmr.msra.gmra.mxu2 %vm518_vm5, %v645_v55  ;;  %v812_v57 = vmul.f32 %v1583_v4, %v811_v56  ;;  %1177 = vst.msk [vmem:[%s1595_s15 + $0x8] sm:$0xff] %vm518_vm5, %v645_v55  ;;  %v856_v4 = vld [vmem:[%s1794_s4 + $0x18] sm:$0xff]  ;;  %v997_v55 = vld [vmem:[%s1775_s10 + $0x28] sm:$0xff] }
 0x3bf   : > { %876 = vmatpush.msrb.mxu1 %v856_v4  ;;  %1017 = vmatpush.msra.mxu0 %v1002_v44 }
 0x3c0   : > { %1185 = vst.msk [vmem:[%s1595_s15 + $0x18] sm:$0xff] %vm518_vm5, %v812_v57 }
 0x3c1   : > { %877 = vmatpush.msrb.mxu1 %v855_v5  ;;  %1018 = vmatpush.msra.mxu0 %v1001_v47  ;;  %v992_v5 = vld [vmem:[%s1775_s10] sm:$0xff] }
 0x3c3   : > { %878 = vmatpush.msrb.mxu1 %v854_v6  ;;  %1019 = vmatpush.msra.mxu0 %v1000_v49 }
 0x3c4   : > { %v816_v58 = vpop.permute.xlu1 %815 }
 0x3c5   : > { %836 = vmatpush.msrb.mxu2 %v816_v58  ;;  %879 = vmatpush.msrb.mxu1 %v853_v7  ;;  %v996_v58 = vld [vmem:[%s1775_s10 + $0x20] sm:$0xff] }
 0x3c6   : > { %1186 = vmatmul.msk.f32.vlgmr.msrb.gmra.mxu2 %vm518_vm5, %v812_v57  ;;  %1020 = vmatpush.msra.mxu0 %v999_v51 }
 0x3c8   : > { %1021 = vmatpush.msra.mxu0 %v998_v53 }
 0x3ca   : > { %1022 = vmatpush.msra.mxu0 %v997_v55 }
 0x3cc   : > { %1023 = vmatpush.msra.mxu0 %v996_v58 }
 0x433   : > { %v591_v59 = vpop.f32.mrf.mxu2 }
 0x43f   : > { %v758_v1 = vpop.f32.mrf.mxu3 }
 0x441   : > { %v671_v60 = vpop.f32.mrf.mxu2 }
 0x442   : > { %675 = vrot.lane.b32.xlu2 %v671_v60, %s1779_s16 }
 0x449   : > { %v838_v61 = vpop.f32.mrf.mxu2 }
 0x44a   : > { %842 = vrot.lane.b32.xlu1 %v838_v61, %s1779_s16  ;;  %v995_v61 = vld [vmem:[%s1775_s10 + $0x18] sm:$0xff]  ;;  %s1040_s16 = scalar_lea.sflag [#allocation6], %s1591_s24 }
 0x44b   : > { %1024 = vmatpush.msra.mxu0 %v995_v61 }
 0x49c   : > { %v676_v62 = vpop.permute.xlu2 %675 }
 0x49d   : > { %v678_v63 = vsel %vm518_vm5, %v591_v59, %v676_v62 }
 0x49e   : > { %680 = vst.msk [vmem:[#allocation2] sm:$0xff] %vm679_vm8, %v678_v63  ;;  %v994_v63 = vld [vmem:[%s1775_s10 + $0x10] sm:$0xff] }
 0x49f   : > { %1025 = vmatpush.msra.mxu0 %v994_v63 }
 0x4bc   : > { %v843_v2 = vpop.permute.xlu1 %842 }
 0x4bd   : > { %v845_v3 = vsel %vm518_vm5, %v758_v1, %v843_v2  ;;  %vm850_vm5 = vcmask 261248  }
 0x4be   : > { %847 = vrot.lane.b32.xlu1 %v845_v3, %s1397_s20  ;;  %v993_v3 = vld [vmem:[%s1775_s10 + $0x8] sm:$0xff]  ;;  %s1066_s20 = sshll.u32 %s1595_s15, 4  ;;  %s1308_s15 = scalar_lea.hbm %s1778_s13, 64  ;;  %s1067_s20 = int_to_ptr.vmem [resolvable:$true] %s1066_s20 }
 0x4bf   : > { %1026 = vmatpush.msra.mxu0 %v993_v3  ;;  %p1310_p1 = scmp.lt.s32.totalorder %s1308_s15, %s1304_s23 }
 0x4c1   : > { %1027 = vmatpush.msra.mxu0 %v992_v5  ;;  %p1311_p2 = por %p1310_p1, %p1309_p0 }
 0x4c3   : > { %p1312_p3 = pnand %p1311_p2, %p1307_p13 }
 0x530   : > { %v848_v9 = vpop.permute.xlu1 %847 }
 0x531   : > { %851 = vst.msk [vmem:[#allocation2] sm:$0xff] %vm850_vm5, %v848_v9 }
 0x538   : > { %v852_v10 = vld [vmem:[#allocation2] sm:$0xff] }
 0x539   : > { %1187 = vmatmul.msk.f32.vlgmr.msrb.gmra.mxu1 %vm450_vm0, %v852_v10 }
 0x5b6   : > { %v881_v12 = vpop.f32.mrf.mxu1 }
 0x5b7   : > { %v882_v13 = vadd.f32 %v1259_v11, %v881_v12 }
 0x5b9   : > { %v1632_v14 = vadd.f32 %v882_v13, %v1522_v0  ;;  %v919_v0 = vld [vmem:[%s1773_s8 + $0x10] sm:$0xff] }
 0x5ba   : > { %941 = vmatpush.msra.mxu3 %v919_v0 }
 0x5bb   : > { %v887_v15 = vsel %vm450_vm0, %v1632_v14, 0.0 }
 0x5bc   : > { %888 = vadd.xlane.f32.xlu2 %v887_v15  ;;  %942 = vmatpush.msra.mxu3 %v918_v22 }
 0x5be   : > { %943 = vmatpush.msra.mxu3 %v917_v23 }
 0x62f   : > { %v889_v16 = vpop.xlane.xlu2 %888 }
 0x630   : > { %v890_v17 = vmul.f32 %v889_v16, %v1526_v8 }
 0x632   : > { %v891_v18 = vsub.f32 %v1632_v14, %v890_v17 }
 0x634   : > { %v892_v19 = vmul.f32 %v891_v18, %v891_v18 }
 0x636   : > { %v893_v20 = vsel %vm450_vm0, %v892_v19, 0.0 }
 0x637   : > { %894 = vadd.xlane.f32.xlu1 %v893_v20 }
 0x6aa   : > { %v895_v24 = vpop.xlane.xlu1 %894 }
 0x6ab   : > { %v896_v25 = vmul.f32 %v895_v24, %v1526_v8  ;;  %v1261_v8 = vld [vmem:[%s1797_s7] ss:$0 sm:$0xff] }
 0x6ad   : > { %v897_v26 = vadd.f32 1e-05, %v896_v25 }
 0x6af   : > { %1284 = vrsqrt.f32 %v897_v26  ;;  %vm904_vm10 = vweird.f32 %v897_v26 }
 0x6b5   : > { %v1285_v27 = vpop.eup %1284 }
 0x6b6   : > { %v899_v28 = vmul.f32 %v1285_v27, %v897_v26  ;;  %vm905_vm9 = vweird.f32 %v1285_v27 }
 0x6b7   : > { %vm906_vm11 = vmor %vm904_vm10, %vm905_vm9 }
 0x6b8   : > { %v900_v29 = vmul.f32 %v1285_v27, %v899_v28 }
 0x6ba   : > { %v901_v30 = vmul.f32 0.5, %v900_v29 }
 0x6bc   : > { %v902_v31 = vsub.f32 1.5, %v901_v30 }
 0x6be   : > { %v903_v32 = vmul.f32 %v1285_v27, %v902_v31 }
 0x6c0   : > { %v907_v34 = vsel %vm906_vm11, %v1285_v27, %v903_v32 }
 0x6c1   : > { %v908_v35 = vmul.f32 %v907_v34, %v891_v18 }
 0x6c3   : > { %v912_v36 = vmul.f32 %v1260_v33, %v908_v35 }
 0x6c5   : > { %v916_v37 = vadd.f32 %v1261_v8, %v912_v36 }
 0x6c7   : > { %1188 = vmatmul.msk.f32.vlgmr.msra.gmra.mxu3 %vm450_vm0, %v916_v37 }
 0x74a   : > { %v945_v45 = vpop.f32.mrf.mxu3 }
 0x74b   : > { %v946_v46 = vadd.f32 %v1262_v41, %v945_v45 }
 0x74d   : > { %v949_v48 = vmul.f32 0.70710677, %v946_v46  ;;  %v948_v31 = vmul.f32 0.5, %v946_v46 }
 0x74f   : > { %v950_v50 = vmul.f32 %v949_v48, %v949_v48 }
 0x751   : > { %v951_v52 = vmin.f32 %v950_v50, 16.0 }
 0x753   : > { %v952_v54 = vmul.f32 2.1237322e-06, %v951_v52  ;;  %v963_v56 = vmul.f32 3.8918573e-05, %v951_v52 }
 0x755   : > { %v953_v57 = vadd.f32 0.00028619796, %v952_v54  ;;  %v964_v59 = vadd.f32 0.001143296, %v963_v56 }
 0x757   : > { %v954_v60 = vmul.f32 %v953_v57, %v951_v52  ;;  %v965_v62 = vmul.f32 %v964_v59, %v951_v52 }
 0x759   : > { %v966_v1 = vadd.f32 0.014752088, %v965_v62  ;;  %v955_v2 = vadd.f32 0.0036580483, %v954_v60 }
 0x75b   : > { %v967_v4 = vmul.f32 %v966_v1, %v951_v52  ;;  %v956_v7 = vmul.f32 %v955_v2, %v951_v52 }
 0x75d   : > { %v968_v6 = vadd.f32 0.112945676, %v967_v4  ;;  %v957_v11 = vadd.f32 0.05243302, %v956_v7 }
 0x75f   : > { %v969_v9 = vmul.f32 %v968_v6, %v951_v52  ;;  %v958_v15 = vmul.f32 %v957_v11, %v951_v52 }
 0x761   : > { %v970_v10 = vadd.f32 0.4994258, %v969_v9  ;;  %v959_v16 = vadd.f32 0.18741608, %v958_v15 }
 0x763   : > { %v971_v12 = vmul.f32 %v970_v10, %v951_v52  ;;  %v960_v18 = vmul.f32 %v959_v16, %v951_v52 }
 0x765   : > { %v972_v13 = vadd.f32 1.0, %v971_v12  ;;  %v961_v0 = vadd.f32 1.1283791, %v960_v18 }
 0x767   : > { %1286 = vrcp.f32 %v972_v13  ;;  %v984_v21 = vand.u32 2147483648, %v972_v13  ;;  %v982_v23 = vand.u32 2147483647, %v972_v13  ;;  %vm978_vm13 = vweird.f32 %v972_v13 }
 0x768   : > { %v962_v26 = vmul.f32 %v961_v0, %v949_v48 }
 0x769   : > { %v985_v25 = vor.u32 1.1754944e-38, %v984_v21  ;;  %vm983_vm15 = vcmp.eq.f32.partialorder %v982_v23, 8.507059e+37 }
 0x76d   : > { %v1287_v17 = vpop.eup %1286 }
 0x76e   : > { %v974_v19 = vmul.f32 %v1287_v17, %v972_v13  ;;  %vm979_vm12 = vweird.f32 %v1287_v17 }
 0x76f   : > { %vm980_vm14 = vmor %vm978_vm13, %vm979_vm12 }
 0x770   : > { %v975_v20 = vsub.f32 1.0, %v974_v19 }
 0x772   : > { %v976_v22 = vmul.f32 %v1287_v17, %v975_v20 }
 0x774   : > { %v977_v24 = vadd.f32 %v1287_v17, %v976_v22 }
 0x776   : > { %v981_v27 = vsel %vm980_vm14, %v1287_v17, %v977_v24 }
 0x777   : > { %v986_v28 = vsel %vm983_vm15, %v985_v25, %v981_v27 }
 0x778   : > { %v987_v29 = vmul.f32 %v986_v28, %v962_v26 }
 0x77a   : > { %v1189_v30 = vclamps-f32 %v987_v29, 1.0 }
 0x77c   : > { %v990_v32 = vadd.f32 1.0, %v1189_v30 }
 0x77e   : > { %v991_v33 = vmul.f32 %v990_v32, %v948_v31 }
 0x780   : > { %1028 = vmatmul.f32.vlgmr.msra.gmra.mxu0 %v991_v33 }
 0x781   : > { %1315 = shalt.err (!%p1312_p3)
}
 0x782   : > { %s1398_s21 = smov 128   ;;  %s1798_s3 = smov 8   ;;  %v1263_v34 = vld [vmem:[%s1776_s11] ss:$0 sm:$0xff] }
 0x783   : > { %1199 = dma.vmem_to_hbm [thread:$0]  (%p1507_p5), %s1067_s20, 512, %s1069_s2, %s1040_s16, %s1398_s21, %s1398_s21, %s1798_s3  }
 0x784   : > { %s1168_s0 = sshll.u32 %s1591_s24, 3  ;;  %s1192_s1 = sshll.u32 %s1490_s29, 3 }
 0x785   : > { %s1050_s22 = scalar_lea.hbm %s1777_s12, %s1192_s1  ;;  %s435_s23 = scalar_lea.vmem [#allocation3], %s1168_s0 }
 0x786   : > { %s1052_s15 = sshll.u32 %s435_s23, 4  ;;  %s1054_s7 = sshll.u32 %s1050_s22, 4  ;;  %s1053_s15 = int_to_ptr.vmem [resolvable:$true] %s1052_s15  ;;  %s1055_s7 = int_to_ptr.hbm [resolvable:$true] %s1054_s7 }
 0x787   : > { %s1035_s29 = scalar_lea.sflag [#allocation4], %s1591_s24  ;;  %s1330_s20 = sshra.s32 %s1055_s7, 4  ;;  %s1331_s20 = int_to_ptr.hbm [resolvable:$true] %s1330_s20 }
 0x788   : > { %s1332_s2 = scalar_lea.hbm %s1331_s20, 8  ;;  %s1336_s3 = scalar_lea.hbm %s1777_s12, 16 }
 0x789   : > { %p1333_p4 = scmp.ne.s32.totalorder %s1331_s20, %s1332_s2  ;;  %p1337_p9 = scmp.lt.s32.totalorder %s1331_s20, %s1777_s12 }
 0x78a   : > { %p1338_p10 = scmp.lt.s32.totalorder %s1336_s3, %s1332_s2 }
 0x78b   : > { %p1334_p7 = pnand %p1333_p4, %p1507_p5 }
 0x78c   : > { %p1339_p11 = por %p1338_p10, %p1337_p9 }
 0x78d   : > { %p1335_p8 = pneg %p1334_p7 }
 0x78f   : > { %p1340_p12 = pnand %p1339_p11, %p1335_p8 }
 0x7fd   : > { %v1029_v35 = vpop.f32.mrf.mxu0 }
 0x7fe   : > { %v1030_v8 = vadd.f32 %v1263_v34, %v1029_v35 }
 0x800   : > { %v1032_v36 = vadd.f32 %v1030_v8, %v1632_v14 }
 0x802   : > { %1033 = vst.msk [vmem:[%s435_s23] sm:$0xff] %vm450_vm0, %v1032_v36 }
 0x803   : > { %1343 = shalt.err (!%p1340_p12)
}
 0x804   : > { %1198 = dma.vmem_to_hbm [thread:$0]  (%p1507_p5), %s1053_s15, 128, %s1055_s7, %s1035_s29  }
 0x805 PF: > { %p1209_p13 = scmp.ge.s32.totalorder %s1382_s28, 2  ;;  %s1083_s24 = sand.u32 1, %s1370_s25  }
 0x806   : > { %s1084_s4 = scalar_lea.sflag [#allocation4], %s1083_s24 }
 0x807   : > { %p1203_p0 = pnand %p1209_p13, %p1511_p6 }
 0x809   : > { %p1204_p1 = pneg %p1203_p0 }
 0x80b   : > { %1361 = dma.done.wait (%p1204_p1), %s1084_s4, 128  }
 0x80c   : > { %1363 = vsyncadd (%p1204_p1), %s1084_s4, 4294967168  ;;  %s1094_s30 = scalar_lea.sflag [#allocation6], %s1083_s24 }
 0x80d   : > { %1365 = dma.done.wait (%p1204_p1), %s1094_s30, 512  }
 0x80e   : > { %1367 = vsyncadd (%p1204_p1), %s1094_s30, 4294966784  ;;  %p27_p5 = scmp.ge.s32.totalorder %s1494_s14, 4   ;;  %s1799_s25 = smov %s1374_s26 }
 0x80f   : > { %s1800_s26 = smov %s1378_s27  ;;  %s1801_s27 = smov %s1505_s17 }
 0x810   : > { %s1802_s28 = smov %s1494_s14  ;;  %29 = sbr.rel (!%p27_p5) target bundleno = 14 (0xe), region = 123 }
 0x815   :  { %1100 = vsyncpa [#allocation4], 1 }
 0x816   :  { %1102 = vsyncpa [#allocation4 + $0x1], 1 }
 0x817   :  { %1103 = vsyncpa [#allocation6], 1 }
 0x818   :  { %1105 = vsyncpa [#allocation6 + $0x1], 1 }

</bundles_post_ra>
